<compile_context>
chip_gen: v7x
topology: tpu7x:2x2x1
jax: 0.10.0
libtpu: 0.0.40
codegen_flags: <defaults>
</compile_context>

<pallas_src>
import jax
import jax.numpy as jnp
from jax.experimental import pallas as pl
from jax.experimental.pallas import tpu as pltpu


EPS = 1e-3  # matches BatchNorm2d(..., eps=0.001)


def _bn_kernel(x_ref, w_ref, b_ref, o_ref):
    # x_ref: (C, M) with M = N*H*W; w_ref / b_ref: (C, 1)
    x = x_ref[...]
    m = x.shape[1]
    inv_m = 1.0 / float(m)

    # Fused statistics pass: one traversal produces sum and sum-of-squares.
    s = jnp.sum(x, axis=1, keepdims=True)           # (C, 1)
    ss = jnp.sum(x * x, axis=1, keepdims=True)      # (C, 1)
    mean = s * inv_m
    var = ss * inv_m - mean * mean
    var = jnp.maximum(var, 0.0)                     # guard against cancellation

    inv = jax.lax.rsqrt(var + EPS)                  # EUP slot, keep as rsqrt
    scale = w_ref[...] * inv                        # (C, 1) per-channel work only
    shift = b_ref[...] - mean * scale               # (C, 1)

    # Wide elementwise pass: 1 mul + 1 add per element.
    o_ref[...] = x * scale + shift


def batchnorm2d(x_nchw, weight, bias):
    """x_nchw: (N, C, H, W) float32; weight/bias: (C,) float32."""
    n, c, h, w = x_nchw.shape
    m = n * h * w

    if n == 1:
        # (1, C, H, W) -> (C, H*W): pure reshape, no transpose/copy needed.
        x2d = x_nchw.reshape(c, m)
    else:
        # General case: bring channel to the leading (sublane) axis.
        x2d = jnp.transpose(x_nchw, (1, 0, 2, 3)).reshape(c, m)

    w2d = weight.reshape(c, 1)
    b2d = bias.reshape(c, 1)

    out2d = pl.pallas_call(
        _bn_kernel,
        out_shape=jax.ShapeDtypeStruct((c, m), jnp.float32),
        in_specs=[
            pl.BlockSpec((c, m), lambda: (0, 0)),   # whole array (~0.5 MB) fits VMEM
            pl.BlockSpec((c, 1), lambda: (0, 0)),
            pl.BlockSpec((c, 1), lambda: (0, 0)),
        ],
        out_specs=pl.BlockSpec((c, m), lambda: (0, 0)),
        compiler_params=pltpu.CompilerParams(vmem_limit_bytes=32 * 1024 * 1024),
    )(x2d, w2d, b2d)

    if n == 1:
        return out2d.reshape(n, c, h, w)
    return jnp.transpose(out2d.reshape(c, n, h, w), (1, 0, 2, 3))


if __name__ == "__main__":
    key = jax.random.PRNGKey(0)
    kx, kw, kb = jax.random.split(key, 3)

    # Shapes from the module: BatchNorm2d(40) on a (1, 40, 56, 56) input.
    N, C, H, W = 1, 40, 56, 56
    x = jax.random.normal(kx, (N, C, H, W), dtype=jnp.float32)

    # Non-trivial affine params to exercise the scale/shift path
    # (PyTorch default init is ones/zeros).
    weight = 1.0 + 0.1 * jax.random.normal(kw, (C,), dtype=jnp.float32)
    bias = 0.1 * jax.random.normal(kb, (C,), dtype=jnp.float32)

    out = batchnorm2d(x, weight, bias)
    jax.block_until_ready(out)

    # Sanity check against a pure-JAX reference of training-mode batchnorm.
    mean = jnp.mean(x, axis=(0, 2, 3), keepdims=True)
    var = jnp.mean((x - mean) ** 2, axis=(0, 2, 3), keepdims=True)
    ref = (x - mean) / jnp.sqrt(var + EPS) * weight.reshape(1, C, 1, 1) + bias.reshape(1, C, 1, 1)
    assert out.shape == (N, C, H, W)
    assert jnp.max(jnp.abs(out - ref)) < 2e-4

    print("KERNEL_OK")
</pallas_src>

<mosaic_0001>
module attributes {stable_mosaic.version = 11 : i64} {
  func.func @_bn_kernel(%arg0: memref<40x3136xf32, #tpu.memory_space<vmem>>, %arg1: memref<40x1xf32, #tpu.memory_space<vmem>>, %arg2: memref<40x1xf32, #tpu.memory_space<vmem>>, %arg3: memref<40x3136xf32, #tpu.memory_space<vmem>>) attributes {dimension_semantics = [], scalar_prefetch = 0 : i64, scratch_operands = 0 : i64, tpu.core_type = #tpu.core_type<tc>} {
    %c0 = arith.constant 0 : index
    %c0_0 = arith.constant 0 : index
    %0 = vector.load %arg0[%c0, %c0_0] : memref<40x3136xf32, #tpu.memory_space<vmem>>, vector<40x3136xf32>
    %cst = arith.constant dense<0.000000e+00> : vector<40xf32>
    %1 = vector.multi_reduction <add>, %0, %cst [1] : vector<40x3136xf32> to vector<40xf32>
    %2 = vector.shape_cast %1 : vector<40xf32> to vector<40x1xf32>
    %3 = arith.mulf %0, %0 : vector<40x3136xf32>
    %cst_1 = arith.constant dense<0.000000e+00> : vector<40xf32>
    %4 = vector.multi_reduction <add>, %3, %cst_1 [1] : vector<40x3136xf32> to vector<40xf32>
    %5 = vector.shape_cast %4 : vector<40xf32> to vector<40x1xf32>
    %cst_2 = arith.constant 3.18877544E-4 : f32
    %6 = vector.broadcast %cst_2 : f32 to vector<40x1xf32>
    %7 = arith.mulf %2, %6 : vector<40x1xf32>
    %cst_3 = arith.constant 3.18877544E-4 : f32
    %8 = vector.broadcast %cst_3 : f32 to vector<40x1xf32>
    %9 = arith.mulf %5, %8 : vector<40x1xf32>
    %10 = arith.mulf %7, %7 : vector<40x1xf32>
    %11 = arith.subf %9, %10 : vector<40x1xf32>
    %cst_4 = arith.constant 0.000000e+00 : f32
    %12 = vector.broadcast %cst_4 : f32 to vector<40x1xf32>
    %13 = arith.maximumf %11, %12 : vector<40x1xf32>
    %cst_5 = arith.constant 1.000000e-03 : f32
    %14 = vector.broadcast %cst_5 : f32 to vector<40x1xf32>
    %15 = arith.addf %13, %14 : vector<40x1xf32>
    %16 = math.rsqrt %15 : vector<40x1xf32>
    %c0_6 = arith.constant 0 : index
    %c0_7 = arith.constant 0 : index
    %17 = vector.load %arg1[%c0_6, %c0_7] : memref<40x1xf32, #tpu.memory_space<vmem>>, vector<40x1xf32>
    %18 = arith.mulf %17, %16 : vector<40x1xf32>
    %c0_8 = arith.constant 0 : index
    %c0_9 = arith.constant 0 : index
    %19 = vector.load %arg2[%c0_8, %c0_9] : memref<40x1xf32, #tpu.memory_space<vmem>>, vector<40x1xf32>
    %20 = arith.mulf %7, %18 : vector<40x1xf32>
    %21 = arith.subf %19, %20 : vector<40x1xf32>
    %22 = vector.broadcast %18 : vector<40x1xf32> to vector<40x3136xf32>
    %23 = arith.mulf %0, %22 : vector<40x3136xf32>
    %24 = vector.broadcast %21 : vector<40x1xf32> to vector<40x3136xf32>
    %25 = arith.addf %23, %24 : vector<40x3136xf32>
    %c0_10 = arith.constant 0 : index
    %c0_11 = arith.constant 0 : index
    %26 = vector.load %arg3[%c0_10, %c0_11] : memref<40x3136xf32, #tpu.memory_space<vmem>>, vector<40x3136xf32>
    tpu.vector_store %arg3[%c0_10, %c0_11], %25 {strides = array<i32>} : memref<40x3136xf32, #tpu.memory_space<vmem>>, vector<40x3136xf32>,
    return
  }
}

</mosaic_0001>

<bundles_post_ra>
// kernel: tpu_custom_call.1
= control target key start
LH: loop header
LB: loop body
LE: loop exit
PB: predicated region body
PF: predicated region fallthrough
CT: control target
= control target key end

     0   :  { %8 = vsyncpa [#allocation3], 0  ;;  %s2261_s0 = inlined_call_operand.hbm [shape: f32[40,3136], index: 0, kind: input, shape index: {}]   ;;  %s2262_s1 = inlined_call_operand.vmem [shape: f32[40,1], index: 1, kind: input, shape index: {}]   ;;  %s2263_s2 = inlined_call_operand.vmem [shape: f32[40,1], index: 2, kind: input, shape index: {}]   ;;  %s2264_s3 = inlined_call_operand.hbm [shape: f32[40,3136], index: 3, kind: output, shape index: {}]  }
   0x1   :  { %9 = vsyncpa [#allocation4], 0  ;;  %s1180_s12 = smov [#allocation2]   ;;  %s1132_s16 = scalar_lea.hbm %s2261_s0, 16000 }
   0x2   :  { %s15_s13 = sshll.u32 %s1180_s12, 4  ;;  %p1133_p0 = scmp.ne.s32.totalorder %s2261_s0, %s1132_s16  ;;  %s16_s13 = int_to_ptr.vmem [resolvable:$true] %s15_s13 }
   0x3   :  { %p1136_p1 = scmp.lt.u32.totalorder %s1132_s16, %s2261_s0 }
   0x5   :  { %p1138_p2 = pnand %p1136_p1, %p1133_p0 }
   0x7   :  { %1141 = shalt.err (!%p1138_p2)
}
   0x8   :  { %s1142_s21 = scalar_lea.vmem %s16_s13, 16000  ;;  %p1147_p4 = scmp.lt.s32.totalorder %s16_s13, %s16_s13 }
   0x9   :  { %p1143_p3 = scmp.ne.s32.totalorder %s16_s13, %s1142_s21  ;;  %p1148_p5 = scmp.lt.s32.totalorder %s1142_s21, %s1142_s21 }
   0xb   :  { %p1149_p6 = por %p1148_p5, %p1147_p4 }
   0xd   :  { %p1150_p7 = pnand %p1149_p6, %p1143_p3 }
   0xf   :  { %1153 = shalt.err (!%p1150_p7)
}
  0x10   :  { %s1181_s22 = smov 3200   ;;  %s1182_s23 = smov 200  }
  0x11   :  { %21 = dma.hbm_to_vmem [thread:$0]  %s2261_s0, 16000, %s16_s13, [#allocation3], %s1181_s22, %s1181_s22, %s1182_s23  }
  0x12   :  { %1176 = dma.done.wait [#allocation3], 16000  }
  0x13   :  { %1177 = vsyncadd [#allocation3], 4294951296  ;;  %v79_v0 = vld [vmem:[#allocation2 + $0x190] sm:$0xff]  ;;  %v80_v1 = vld [vmem:[#allocation2 + $0x198] sm:$0xff]  ;;  %vm177_vm0 = vcmask 523264  }
  0x14   :  { %v81_v2 = vld [vmem:[#allocation2 + $0x1a0] sm:$0xff]  ;;  %v209_v3 = vadd.f32 %v80_v1, %v79_v0  ;;  %v82_v4 = vld [vmem:[#allocation2 + $0x1a8] sm:$0xff]  ;;  %v340_v6 = vmul.f32 %v79_v0, %v79_v0  ;;  %v341_v7 = vmul.f32 %v80_v1, %v80_v1  ;;  %v83_v8 = vld [vmem:[#allocation2 + $0x1b0] sm:$0xff] }
  0x15   :  { %v84_v10 = vld [vmem:[#allocation2 + $0x1b8] sm:$0xff]  ;;  %v342_v12 = vmul.f32 %v81_v2, %v81_v2  ;;  %v85_v14 = vld [vmem:[#allocation2 + $0x1c0] sm:$0xff]  ;;  %v30_v16 = vld [vmem:[#allocation2 + $0x8] sm:$0xff]  ;;  %v343_v24 = vmul.f32 %v82_v4, %v82_v4  ;;  %v344_v36 = vmul.f32 %v83_v8, %v83_v8 }
  0x16   :  { %v210_v5 = vadd.f32 %v209_v3, %v81_v2  ;;  %v469_v13 = vadd.f32 %v341_v7, %v340_v6  ;;  %v29_v15 = vld [vmem:[#allocation2] sm:$0xff]  ;;  %v31_v18 = vld [vmem:[#allocation2 + $0x10] sm:$0xff]  ;;  %v86_v20 = vld [vmem:[#allocation2 + $0x1c8] sm:$0xff]  ;;  %v291_v33 = vmul.f32 %v30_v16, %v30_v16  ;;  %v345_v42 = vmul.f32 %v84_v10, %v84_v10 }
  0x17   :  { %v154_v19 = vadd.f32 %v30_v16, %v29_v15  ;;  %v32_v21 = vld [vmem:[#allocation2 + $0x18] sm:$0xff]  ;;  %v87_v26 = vld [vmem:[#allocation2 + $0x1d0] sm:$0xff]  ;;  %v33_v27 = vld [vmem:[#allocation2 + $0x20] sm:$0xff]  ;;  %v290_v32 = vmul.f32 %v29_v15, %v29_v15  ;;  %v292_v41 = vmul.f32 %v31_v18, %v31_v18  ;;  %v346_v43 = vmul.f32 %v85_v14, %v85_v14 }
  0x18   :  { %v211_v9 = vadd.f32 %v210_v5, %v82_v4  ;;  %v470_v25 = vadd.f32 %v469_v13, %v342_v12  ;;  %v88_v30 = vld [vmem:[#allocation2 + $0x1d8] sm:$0xff]  ;;  %v34_v31 = vld [vmem:[#allocation2 + $0x28] sm:$0xff]  ;;  %v89_v38 = vld [vmem:[#allocation2 + $0x1e0] sm:$0xff]  ;;  %v347_v48 = vmul.f32 %v86_v20, %v86_v20  ;;  %v348_v49 = vmul.f32 %v87_v26, %v87_v26 }
  0x19   :  { %v155_v23 = vadd.f32 %v154_v19, %v31_v18  ;;  %v35_v39 = vld [vmem:[#allocation2 + $0x30] sm:$0xff]  ;;  %v1220_v40 = vld [vmem:[#allocation2 + $0x258] sm:$0xff]  ;;  %v1222_v46 = vld [vmem:[#allocation2 + $0x260] sm:$0xff]  ;;  %v293_v53 = vmul.f32 %v32_v21, %v32_v21  ;;  %v415_v54 = vadd.f32 %v291_v33, %v290_v32  ;;  %v1228_v55 = vmul.f32 %v88_v30, %v88_v30 }
  0x1a   :  { %v212_v11 = vadd.f32 %v211_v9, %v83_v8  ;;  %v471_v37 = vadd.f32 %v470_v25, %v343_v24  ;;  %v1224_v47 = vld [vmem:[#allocation2 + $0x268] sm:$0xff]  ;;  %v36_v51 = vld [vmem:[#allocation2 + $0x38] sm:$0xff]  ;;  %v236_v52 = vadd.f32 %v1222_v46, %v1220_v40  ;;  %v1230_v58 = vld [vmem:[#allocation2 + $0x270] sm:$0xff]  ;;  %v1232_v59 = vmul.f32 %v89_v38, %v89_v38 }
  0x1b   :  { %v156_v29 = vadd.f32 %v155_v23, %v32_v21  ;;  %v90_v50 = vld [vmem:[#allocation2 + $0x1e8] sm:$0xff]  ;;  %v91_v61 = vld [vmem:[#allocation2 + $0x1f0] sm:$0xff]  ;;  %v37_v62 = vld [vmem:[#allocation2 + $0x40] sm:$0xff]  ;;  %v294_v0 = vmul.f32 %v33_v27, %v33_v27  ;;  %v416_v1 = vadd.f32 %v415_v54, %v292_v41  ;;  %v295_v12 = vmul.f32 %v34_v31, %v34_v31 }
  0x1c   :  { %v213_v17 = vadd.f32 %v212_v11, %v84_v10  ;;  %v472_v60 = vadd.f32 %v471_v37, %v344_v36  ;;  %v237_v63 = vadd.f32 %v236_v52, %v1224_v47  ;;  %v1235_v2 = vmul.f32 %v90_v50, %v90_v50  ;;  %v92_v3 = vld [vmem:[#allocation2 + $0x1f8] sm:$0xff]  ;;  %v93_v9 = vld [vmem:[#allocation2 + $0x200] sm:$0xff]  ;;  %v38_v10 = vld [vmem:[#allocation2 + $0x48] sm:$0xff] }
  0x1d   :  { %v157_v35 = vadd.f32 %v156_v29, %v33_v27  ;;  %v1237_v6 = vld [vmem:[#allocation2 + $0x278] sm:$0xff]  ;;  %v1239_v7 = vmul.f32 %v91_v61, %v91_v61  ;;  %v417_v13 = vadd.f32 %v416_v1, %v293_v53  ;;  %v94_v15 = vld [vmem:[#allocation2 + $0x208] sm:$0xff]  ;;  %v1244_v18 = vld [vmem:[#allocation2 + $0x280] sm:$0xff]  ;;  %v1246_v19 = vmul.f32 %v93_v9, %v93_v9 }
  0x1e   :  { %v214_v22 = vadd.f32 %v213_v17, %v85_v14  ;;  %v473_v8 = vadd.f32 %v472_v60, %v345_v42  ;;  %v238_v11 = vadd.f32 %v237_v63, %v1230_v58  ;;  %v1242_v14 = vmul.f32 %v92_v3, %v92_v3  ;;  %2314 = vst [vmem:[#allocation8_spill] sm:$0xff] %v1244_v18  ;;  %v95_v21 = vld [vmem:[#allocation2 + $0x210] sm:$0xff]  ;;  %v1248_v23 = vld [vmem:[#allocation2 + $0x288] sm:$0xff]  ;;  %v1257_v32 = vld [vmem:[#allocation2 + $0xd8] sm:$0xff] }
  0x1f   :  { %v158_v45 = vadd.f32 %v157_v35, %v34_v31  ;;  %2315 = vst [vmem:[#allocation9_spill] sm:$0xff] %v1248_v23  ;;  %v296_v25 = vmul.f32 %v35_v39, %v35_v39  ;;  %v1251_v27 = vmul.f32 %v94_v15, %v94_v15  ;;  %v1255_v31 = vld [vmem:[#allocation2 + $0xd0] sm:$0xff]  ;;  %v1259_v33 = vmul.f32 %v95_v21, %v95_v21  ;;  %v96_v35 = vld [vmem:[#allocation2 + $0x218] sm:$0xff]  ;;  %v1272_v53 = vld [vmem:[#allocation2 + $0x60] sm:$0xff] }
  0x20   :  { %v215_v28 = vadd.f32 %v214_v22, %v86_v20  ;;  %v474_v20 = vadd.f32 %v473_v8, %v346_v43  ;;  %v39_v22 = vld [vmem:[#allocation2 + $0x50] sm:$0xff]  ;;  %v239_v24 = vadd.f32 %v238_v11, %v1237_v6  ;;  %v1261_v36 = vld [vmem:[#allocation2 + $0x58] sm:$0xff]  ;;  %2318 = vst [vmem:[#allocation12_spill] sm:$0xff] %v1272_v53 }
  0x21   :  { %v159_v57 = vadd.f32 %v158_v45, %v35_v39  ;;  %2316 = vst [vmem:[#allocation10_spill] sm:$0xff] %v1261_v36  ;;  %v297_v39 = vmul.f32 %v36_v51, %v36_v51  ;;  %v1268_v45 = vld [vmem:[#allocation2 + $0xe0] sm:$0xff]  ;;  %v1277_v63 = vld [vmem:[#allocation2 + $0x298] sm:$0xff] }
  0x22   :  { %v216_v34 = vadd.f32 %v215_v28, %v87_v26  ;;  %v418_v26 = vadd.f32 %v417_v13, %v294_v0  ;;  %v240_v37 = vadd.f32 %v239_v24, %v1244_v18  ;;  %2319 = vst [vmem:[#allocation13_spill] sm:$0xff] %v1277_v63  ;;  %v1279_v0 = vld [vmem:[#allocation2 + $0xe8] sm:$0xff]  ;;  %v1492_v18 = vld [vmem:[#allocation2 + $0x300] sm:$0xff] }
  0x23   :  { %v160_v5 = vadd.f32 %v159_v57, %v36_v51  ;;  %v298_v57 = vmul.f32 %v37_v62, %v37_v62  ;;  %2320 = vst [vmem:[#allocation14_spill] sm:$0xff] %v1279_v0  ;;  %v1300_v24 = vld [vmem:[#allocation2 + $0x2a8] sm:$0xff]  ;;  %2351 = vst [vmem:[#allocation45_spill] sm:$0xff] %v1492_v18 }
  0x24   :  { %v217_v44 = vadd.f32 %v216_v34, %v88_v30  ;;  %v1253_v30 = vld [vmem:[#allocation2 + $0xc8] sm:$0xff]  ;;  %v475_v34 = vadd.f32 %v474_v20, %v347_v48  ;;  %v419_v41 = vadd.f32 %v418_v26, %v295_v12  ;;  %v97_v48 = vld [vmem:[#allocation2 + $0x220] sm:$0xff]  ;;  %v241_v54 = vadd.f32 %v240_v37, %v1248_v23  ;;  %v1298_v20 = vld [vmem:[#allocation2 + $0x70] sm:$0xff]  ;;  %2324 = vst [vmem:[#allocation18_spill] sm:$0xff] %v1300_v24 }
  0x25   :  { %v161_v17 = vadd.f32 %v160_v5, %v37_v62  ;;  %v1281_v1 = vmul.f32 %v97_v48, %v97_v48  ;;  %v1286_v5 = vld [vmem:[#allocation2 + $0x68] sm:$0xff]  ;;  %2323 = vst [vmem:[#allocation17_spill] sm:$0xff] %v1298_v20  ;;  %v300_v26 = vmul.f32 %v39_v22, %v39_v22  ;;  %v1309_v37 = vld [vmem:[#allocation2 + $0xf8] sm:$0xff] }
  0x26   :  { %v218_v56 = vadd.f32 %v217_v44, %v89_v38  ;;  %v182_v38 = vadd.f32 %v1255_v31, %v1253_v30  ;;  %v1266_v44 = vld [vmem:[#allocation2 + $0x290] sm:$0xff]  ;;  %v476_v52 = vadd.f32 %v475_v34, %v348_v49  ;;  %v420_v60 = vadd.f32 %v419_v41, %v296_v25  ;;  %2321 = vst [vmem:[#allocation15_spill] sm:$0xff] %v1286_v5  ;;  %v1316_v41 = vld [vmem:[#allocation2 + $0x78] sm:$0xff] }
  0x27   :  { %v162_v29 = vadd.f32 %v161_v17, %v38_v10  ;;  %2317 = vst [vmem:[#allocation11_spill] sm:$0xff] %v1266_v44  ;;  %v242_v8 = vadd.f32 %v241_v54, %v1266_v44  ;;  %2325 = vst [vmem:[#allocation19_spill] sm:$0xff] %v1316_v41  ;;  %v1463_v44 = vld [vmem:[#allocation2 + $0x2f0] sm:$0xff] }
  0x28   :  { %v219_v4 = vadd.f32 %v218_v56, %v90_v50  ;;  %v1270_v50 = vmul.f32 %v96_v35, %v96_v35  ;;  %v183_v56 = vadd.f32 %v182_v38, %v1257_v32  ;;  %v477_v49 = vadd.f32 %v476_v52, %v1228_v55  ;;  %v1313_v38 = vld [vmem:[#allocation2 + $0x328] sm:$0xff]  ;;  %v1322_v52 = vld [vmem:[#allocation2 + $0x330] sm:$0xff]  ;;  %2349 = vst [vmem:[#allocation43_spill] sm:$0xff] %v1463_v44 }
  0x29   :  { %v163_v43 = vadd.f32 %v162_v29, %v39_v22  ;;  %v421_v11 = vadd.f32 %v420_v60, %v297_v39  ;;  %v243_v25 = vadd.f32 %v242_v8, %v1277_v63  ;;  %v1327_v60 = vld [vmem:[#allocation2 + $0x100] sm:$0xff] }
  0x2a   :  { %v220_v16 = vadd.f32 %v219_v4, %v91_v61  ;;  %v1284_v4 = vld [vmem:[#allocation2 + $0x250] sm:$0xff]  ;;  %v184_v62 = vadd.f32 %v183_v56, %v1268_v45  ;;  %v478_v55 = vadd.f32 %v477_v49, %v1232_v59  ;;  %v1311_v59 = vld [vmem:[#allocation2 + $0x320] sm:$0xff]  ;;  %2327 = vst [vmem:[#allocation21_spill] sm:$0xff] %v1327_v60 }
  0x2b   :  { %v164_v61 = vadd.f32 %v163_v43, %v1261_v36  ;;  %v1306_v29 = vsel %vm177_vm0, %v1284_v4, 0.0  ;;  %v1334_v49 = vld [vmem:[#allocation2 + $0x80] sm:$0xff] }
  0x2c   :  { %v221_v28 = vadd.f32 %v220_v16, %v92_v3  ;;  %v98_v3 = vld [vmem:[#allocation2 + $0x228] sm:$0xff]  ;;  %v1293_v16 = vld [vmem:[#allocation2 + $0xf0] sm:$0xff]  ;;  %v479_v39 = vadd.f32 %v478_v55, %v1235_v2  ;;  %v263_v2 = vadd.f32 %v1313_v38, %v1311_v59  ;;  %2329 = vst [vmem:[#allocation23_spill] sm:$0xff] %v1334_v49  ;;  %v1343_v55 = vld [vmem:[#allocation2 + $0x2b8] sm:$0xff] }
  0x2d   :  { %v165_v13 = vadd.f32 %v164_v61, %v1272_v53  ;;  %v1295_v17 = vmul.f32 %v98_v3, %v98_v3  ;;  %v1332_v61 = vld [vmem:[#allocation2 + $0x230] sm:$0xff]  ;;  %2330 = vst [vmem:[#allocation24_spill] sm:$0xff] %v1343_v55  ;;  %v1429_v63 = vld [vmem:[#allocation2 + $0x2e0] sm:$0xff] }
  0x2e   :  { %v222_v42 = vadd.f32 %v221_v28, %v93_v9  ;;  %v299_v9 = vmul.f32 %v38_v10, %v38_v10  ;;  %v185_v10 = vadd.f32 %v184_v62, %v1279_v0  ;;  %2328 = vst [vmem:[#allocation22_spill] sm:$0xff] %v1332_v61  ;;  %2343 = vst [vmem:[#allocation37_spill] sm:$0xff] %v1429_v63 }
  0x2f   :  { %v166_v34 = vadd.f32 %v165_v13, %v1286_v5 }
  0x30   :  { %v223_v51 = vadd.f32 %v222_v42, %v94_v15  ;;  %v1291_v15 = vld [vmem:[#allocation2 + $0x2a0] sm:$0xff]  ;;  %v301_v42 = vmul.f32 %v1261_v36, %v1261_v36  ;;  %v1385_v36 = vld [vmem:[#allocation2 + $0x248] sm:$0xff] }
  0x31   :  { %2322 = vst [vmem:[#allocation16_spill] sm:$0xff] %v1291_v15  ;;  %v244_v22 = vadd.f32 %v243_v25, %v1291_v15  ;;  %v167_v56 = vadd.f32 %v166_v34, %v1298_v20  ;;  %v264_v25 = vadd.f32 %v263_v2, %v1322_v52  ;;  %2337 = vst [vmem:[#allocation31_spill] sm:$0xff] %v1385_v36  ;;  %v1413_v15 = vld [vmem:[#allocation2 + $0x2d8] sm:$0xff] }
  0x32   :  { %v224_v12 = vadd.f32 %v223_v51, %v95_v21  ;;  %v422_v21 = vadd.f32 %v421_v11, %v298_v57  ;;  %v1325_v57 = vld [vmem:[#allocation2 + $0x2b0] sm:$0xff]  ;;  %v480_v51 = vadd.f32 %v479_v39, %v1239_v7  ;;  %v1340_v11 = vld [vmem:[#allocation2 + $0x338] sm:$0xff]  ;;  %v1345_v7 = vld [vmem:[#allocation2 + $0x108] sm:$0xff]  ;;  %2341 = vst [vmem:[#allocation35_spill] sm:$0xff] %v1413_v15 }
  0x33   :  { %2326 = vst [vmem:[#allocation20_spill] sm:$0xff] %v1325_v57  ;;  %v245_v8 = vadd.f32 %v244_v22, %v1300_v24  ;;  %v168_v13 = vadd.f32 %v167_v56, %v1316_v41  ;;  %v1357_v22 = vld [vmem:[#allocation2 + $0x340] sm:$0xff]  ;;  %v265_v56 = vadd.f32 %v264_v25, %v1340_v11 }
  0x34   :  { %v225_v28 = vadd.f32 %v224_v12, %v96_v35  ;;  %v186_v35 = vadd.f32 %v185_v10, %v1293_v16  ;;  %v423_v43 = vadd.f32 %v422_v21, %v299_v9  ;;  %v481_v10 = vadd.f32 %v480_v51, %v1242_v14  ;;  %v1349_v21 = vld [vmem:[#allocation2 + $0x238] sm:$0xff]  ;;  %v1363_v14 = vld [vmem:[#allocation2 + $0x110] sm:$0xff]  ;;  %v1367_v51 = vld [vmem:[#allocation2 + $0x240] sm:$0xff] }
  0x35   :  { %2331 = vst [vmem:[#allocation25_spill] sm:$0xff] %v1349_v21  ;;  %v246_v34 = vadd.f32 %v245_v8, %v1325_v57  ;;  %2334 = vst [vmem:[#allocation28_spill] sm:$0xff] %v1367_v51  ;;  %v1369_v8 = vld [vmem:[#allocation2 + $0x90] sm:$0xff]  ;;  %v362_v23 = vmul.f32 %v1367_v51, %v1367_v51 }
  0x36   :  { %v226_v54 = vadd.f32 %v225_v28, %v97_v48  ;;  %v187_v62 = vadd.f32 %v186_v35, %v1309_v37  ;;  %v302_v48 = vmul.f32 %v1272_v53, %v1272_v53  ;;  %v424_v9 = vadd.f32 %v423_v43, %v300_v26  ;;  %v1351_v28 = vld [vmem:[#allocation2 + $0x88] sm:$0xff]  ;;  %2335 = vst [vmem:[#allocation29_spill] sm:$0xff] %v1369_v8  ;;  %v1397_v57 = vld [vmem:[#allocation2 + $0x2d0] sm:$0xff] }
  0x37   :  { %2332 = vst [vmem:[#allocation26_spill] sm:$0xff] %v1351_v28  ;;  %v169_v43 = vadd.f32 %v168_v13, %v1334_v49  ;;  %v482_v2 = vadd.f32 %v481_v10, %v1246_v19  ;;  %v1375_v13 = vld [vmem:[#allocation2 + $0x348] sm:$0xff]  ;;  %v1381_v19 = vld [vmem:[#allocation2 + $0x118] sm:$0xff]  ;;  %v266_v10 = vadd.f32 %v265_v56, %v1357_v22  ;;  %2339 = vst [vmem:[#allocation33_spill] sm:$0xff] %v1397_v57 }
  0x38   :  { %v227_v12 = vadd.f32 %v226_v54, %v98_v3  ;;  %v188_v26 = vadd.f32 %v187_v62, %v1327_v60  ;;  %v303_v3 = vmul.f32 %v1286_v5, %v1286_v5  ;;  %v425_v39 = vadd.f32 %v424_v9, %v301_v42  ;;  %v1361_v54 = vld [vmem:[#allocation2 + $0x2c0] sm:$0xff]  ;;  %v1379_v53 = vld [vmem:[#allocation2 + $0x2c8] sm:$0xff] }
  0x39   :  { %2333 = vst [vmem:[#allocation27_spill] sm:$0xff] %v1361_v54  ;;  %v247_v42 = vadd.f32 %v246_v34, %v1343_v55  ;;  %v304_v9 = vmul.f32 %v1298_v20, %v1298_v20  ;;  %v170_v25 = vadd.f32 %v169_v43, %v1351_v28  ;;  %2336 = vst [vmem:[#allocation30_spill] sm:$0xff] %v1379_v53  ;;  %v1393_v20 = vld [vmem:[#allocation2 + $0x350] sm:$0xff] }
  0x3a   :  { %v228_v35 = vadd.f32 %v227_v12, %v1332_v61  ;;  %v189_v62 = vadd.f32 %v188_v26, %v1345_v7  ;;  %v426_v12 = vadd.f32 %v425_v39, %v302_v48  ;;  %v483_v34 = vadd.f32 %v482_v2, %v1251_v27  ;;  %v1387_v26 = vld [vmem:[#allocation2 + $0x98] sm:$0xff]  ;;  %v1399_v27 = vld [vmem:[#allocation2 + $0x120] sm:$0xff] }
  0x3b   :  { %2338 = vst [vmem:[#allocation32_spill] sm:$0xff] %v1387_v26  ;;  %v248_v48 = vadd.f32 %v247_v42, %v1361_v54  ;;  %v171_v56 = vadd.f32 %v170_v25, %v1369_v8  ;;  %v267_v2 = vadd.f32 %v266_v10, %v1375_v13  ;;  %v1403_v54 = vld [vmem:[#allocation2 + $0xa0] sm:$0xff]  ;;  %v1415_v10 = vld [vmem:[#allocation2 + $0x128] sm:$0xff] }
  0x3c   :  { %v229_v5 = vadd.f32 %v228_v35, %v1349_v21  ;;  %v190_v39 = vadd.f32 %v189_v62, %v1363_v14  ;;  %v305_v35 = vmul.f32 %v1316_v41, %v1316_v41  ;;  %v427_v43 = vadd.f32 %v426_v12, %v303_v3  ;;  %2340 = vst [vmem:[#allocation34_spill] sm:$0xff] %v1403_v54  ;;  %v1409_v41 = vld [vmem:[#allocation2 + $0x358] sm:$0xff] }
  0x3d   :  { %v484_v42 = vadd.f32 %v483_v34, %v1259_v33  ;;  %v249_v62 = vadd.f32 %v248_v48, %v1379_v53  ;;  %v306_v12 = vmul.f32 %v1334_v49, %v1334_v49  ;;  %v172_v24 = vadd.f32 %v171_v56, %v1387_v26  ;;  %v1419_v48 = vld [vmem:[#allocation2 + $0xa8] sm:$0xff]  ;;  %v1425_v49 = vld [vmem:[#allocation2 + $0x360] sm:$0xff] }
  0x3e   :  { %v230_v55 = vadd.f32 %v229_v5, %v1367_v51  ;;  %v191_v3 = vadd.f32 %v190_v39, %v1381_v19  ;;  %v428_v5 = vadd.f32 %v427_v43, %v304_v9  ;;  %v268_v33 = vadd.f32 %v267_v2, %v1393_v20  ;;  %2342 = vst [vmem:[#allocation36_spill] sm:$0xff] %v1419_v48  ;;  %v1431_v2 = vld [vmem:[#allocation2 + $0x130] sm:$0xff] }
  0x3f   :  { %v485_v34 = vadd.f32 %v484_v42, %v1270_v50  ;;  %v250_v39 = vadd.f32 %v249_v62, %v1397_v57  ;;  %v307_v43 = vmul.f32 %v1351_v28, %v1351_v28  ;;  %v173_v53 = vadd.f32 %v172_v24, %v1403_v54  ;;  %v1435_v62 = vld [vmem:[#allocation2 + $0xb0] sm:$0xff]  ;;  %v1443_v24 = vld [vmem:[#allocation2 + $0xc0] sm:$0xff] }
  0x40   :  { %v231_v25 = vadd.f32 %v230_v55, %v1385_v36  ;;  %v192_v9 = vadd.f32 %v191_v3, %v1399_v27  ;;  %v429_v55 = vadd.f32 %v428_v5, %v305_v35  ;;  %v269_v50 = vadd.f32 %v268_v33, %v1409_v41  ;;  %2344 = vst [vmem:[#allocation38_spill] sm:$0xff] %v1435_v62  ;;  %v1446_v33 = vld [vmem:[#allocation2 + $0x2e8] sm:$0xff] }
  0x41   :  { %v486_v42 = vadd.f32 %v485_v34, %v1281_v1  ;;  %v251_v3 = vadd.f32 %v250_v39, %v1413_v15  ;;  %v308_v5 = vmul.f32 %v1369_v8, %v1369_v8  ;;  %2346 = vst [vmem:[#allocation40_spill] sm:$0xff] %v1443_v24  ;;  %v174_v28 = vadd.f32 %v173_v53, %v1419_v48  ;;  %v1448_v1 = vld [vmem:[#allocation2 + $0x138] sm:$0xff]  ;;  %v1459_v53 = vld [vmem:[#allocation2 + $0x370] sm:$0xff] }
  0x42   :  { %v233_v56 = vadd.f32 %v1306_v29, %v231_v25  ;;  %v193_v35 = vadd.f32 %v192_v9, %v1415_v10  ;;  %v430_v29 = vadd.f32 %v429_v55, %v306_v12  ;;  %v1441_v25 = vld [vmem:[#allocation2 + $0x368] sm:$0xff]  ;;  %2347 = vst [vmem:[#allocation41_spill] sm:$0xff] %v1446_v33  ;;  %v309_v34 = vmul.f32 %v1387_v26, %v1387_v26  ;;  %v1455_v12 = vld [vmem:[#allocation2 + $0xb8] sm:$0xff]  ;;  %v1465_v26 = vld [vmem:[#allocation2 + $0x140] sm:$0xff] }
  0x43   :  { %2345 = vst [vmem:[#allocation39_spill] sm:$0xff] %v1441_v25  ;;  %v270_v39 = vadd.f32 %v269_v50, %v1425_v49  ;;  %v360_v9 = vmul.f32 %v1332_v61, %v1332_v61  ;;  %2348 = vst [vmem:[#allocation42_spill] sm:$0xff] %v1455_v12  ;;  %v252_v55 = vadd.f32 %v251_v3, %v1429_v63  ;;  %v1479_v63 = vld [vmem:[#allocation2 + $0x2f8] sm:$0xff] }
  0x44   :  { %234 = vadd.xlane.f32.xlu1 %v233_v56  ;;  %v194_v56 = vadd.f32 %v193_v35, %v1431_v2  ;;  %v431_v8 = vadd.f32 %v430_v29, %v307_v43  ;;  %v487_v15 = vadd.f32 %v486_v42, %v1295_v17  ;;  %v175_v57 = vadd.f32 %v174_v28, %v1435_v62  ;;  %v1476_v42 = vld [vmem:[#allocation2 + $0x378] sm:$0xff] }
  0x45   :  { %v310_v50 = vmul.f32 %v1403_v54, %v1403_v54  ;;  %v271_v61 = vadd.f32 %v270_v39, %v1441_v25  ;;  %v361_v3 = vmul.f32 %v1349_v21, %v1349_v21  ;;  %v178_v43 = vsel %vm177_vm0, %v1443_v24, 0.0  ;;  %2350 = vst [vmem:[#allocation44_spill] sm:$0xff] %v1479_v63  ;;  %v1481_v54 = vld [vmem:[#allocation2 + $0x148] sm:$0xff]  ;;  %v1494_v25 = vld [vmem:[#allocation2 + $0x150] sm:$0xff] }
  0x46   :  { %v253_v35 = vadd.f32 %v252_v55, %v1446_v33  ;;  %v195_v17 = vadd.f32 %v194_v56, %v1448_v1  ;;  %v432_v28 = vadd.f32 %v431_v8, %v308_v5  ;;  %v176_v29 = vadd.f32 %v175_v57, %v1455_v12  ;;  %v1490_v56 = vld [vmem:[#allocation2 + $0x380] sm:$0xff] }
  0x47   :  { %v311_v39 = vmul.f32 %v1419_v48, %v1419_v48  ;;  %v272_v21 = vadd.f32 %v271_v61, %v1459_v53  ;;  %v488_v57 = vadd.f32 %v487_v15, %v360_v9  ;;  %v315_v61 = vmul.f32 %v1253_v30, %v1253_v30 }
  0x48   :  { %v254_v55 = vadd.f32 %v253_v35, %v1463_v44  ;;  %v196_v8 = vadd.f32 %v195_v17, %v1465_v26  ;;  %v433_v5 = vadd.f32 %v432_v28, %v309_v34  ;;  %v179_v33 = vadd.f32 %v178_v43, %v176_v29  ;;  %v1505_v43 = vld [vmem:[#allocation2 + $0x388] sm:$0xff] }
  0x49   :  { %v273_v48 = vadd.f32 %v272_v21, %v1476_v42  ;;  %v316_v51 = vmul.f32 %v1255_v31, %v1255_v31  ;;  %v312_v15 = vmul.f32 %v1435_v62, %v1435_v62  ;;  %v1507_v17 = vld [vmem:[#allocation2 + $0x308] sm:$0xff]  ;;  %v1509_v21 = vld [vmem:[#allocation2 + $0x158] sm:$0xff]  ;;  %v313_v30 = vmul.f32 %v1455_v12, %v1455_v12  ;;  %v1526_v12 = vld [vmem:[#allocation2 + $0x160] sm:$0xff] }
  0x4a   :  { %v255_v35 = vadd.f32 %v254_v55, %v1479_v63  ;;  %v197_v34 = vadd.f32 %v196_v8, %v1481_v54  ;;  %v434_v9 = vadd.f32 %v433_v5, %v310_v50  ;;  %180 = vadd.xlane.f32.xlu0 %v179_v33  ;;  %2352 = vst [vmem:[#allocation46_spill] sm:$0xff] %v1507_v17  ;;  %v1518_v55 = vld [vmem:[#allocation2 + $0x318] sm:$0xff]  ;;  %v1522_v5 = vld [vmem:[#allocation2 + $0x390] sm:$0xff] }
  0x4b   :  { %v274_v31 = vadd.f32 %v273_v48, %v1490_v56  ;;  %v363_v28 = vmul.f32 %v1385_v36, %v1385_v36  ;;  %v317_v29 = vmul.f32 %v1257_v32, %v1257_v32  ;;  %2353 = vst [vmem:[#allocation47_spill] sm:$0xff] %v1518_v55  ;;  %v489_v62 = vadd.f32 %v488_v57, %v361_v3  ;;  %v1524_v63 = vld [vmem:[#allocation2 + $0x310] sm:$0xff] }
  0x4c   :  { %v256_v50 = vadd.f32 %v255_v35, %v1492_v18  ;;  %v198_v33 = vadd.f32 %v197_v34, %v1494_v25  ;;  %v435_v8 = vadd.f32 %v434_v9, %v311_v39  ;;  %v314_v48 = vmul.f32 %v1443_v24, %v1443_v24  ;;  %v1535_v9 = vld [vmem:[#allocation2 + $0x398] sm:$0xff]  ;;  %v1541_v24 = vld [vmem:[#allocation2 + $0x168] sm:$0xff] }
  0x4d   :  { %v275_v36 = vadd.f32 %v274_v31, %v1505_v43  ;;  %v318_v32 = vmul.f32 %v1268_v45, %v1268_v45  ;;  %v442_v44 = vadd.f32 %v316_v51, %v315_v61  ;;  %v364_v3 = vmul.f32 %v1284_v4, %v1284_v4  ;;  %v1550_v4 = vld [vmem:[#allocation2 + $0x170] sm:$0xff] }
  0x4e   :  { %v257_v35 = vadd.f32 %v256_v50, %v1507_v17  ;;  %v199_v39 = vadd.f32 %v198_v33, %v1509_v21  ;;  %v436_v34 = vadd.f32 %v435_v8, %v312_v15  ;;  %v259_v57 = vsel %vm177_vm0, %v1518_v55, 0.0  ;;  %v1548_v33 = vld [vmem:[#allocation2 + $0x3a0] sm:$0xff] }
  0x4f   :  { %v276_v31 = vadd.f32 %v275_v36, %v1522_v5  ;;  %v319_v45 = vmul.f32 %v1279_v0, %v1279_v0  ;;  %v443_v51 = vadd.f32 %v442_v44, %v317_v29  ;;  %v490_v8 = vadd.f32 %v489_v62, %v362_v23  ;;  %v1557_v29 = vld [vmem:[#allocation2 + $0x3a8] sm:$0xff] }
  0x50   :  { %v258_v61 = vadd.f32 %v257_v35, %v1524_v63  ;;  %v200_v15 = vadd.f32 %v199_v39, %v1526_v12  ;;  %v437_v50 = vadd.f32 %v436_v34, %v313_v30  ;;  %v438_v55 = vsel %vm177_vm0, %v314_v48, 0.0  ;;  %2354 = vst [vmem:[#allocation48_spill] sm:$0xff] %v1557_v29  ;;  %v1559_v35 = vld [vmem:[#allocation2 + $0x178] sm:$0xff]  ;;  %v1564_v48 = vld [vmem:[#allocation2 + $0x188] sm:$0xff] }
  0x51   :  { %v277_v17 = vadd.f32 %v276_v31, %v1535_v9  ;;  %v320_v36 = vmul.f32 %v1293_v16, %v1293_v16  ;;  %v444_v18 = vadd.f32 %v443_v51, %v318_v32  ;;  %v321_v23 = vmul.f32 %v1309_v37, %v1309_v37  ;;  %v1567_v32 = vld [vmem:[#allocation2 + $0x3b0] sm:$0xff]  ;;  %v1569_v31 = vld [vmem:[#allocation2 + $0x180] sm:$0xff] }
  0x52   :  { %v260_v0 = vadd.f32 %v259_v57, %v258_v61  ;;  %v201_v44 = vadd.f32 %v200_v15, %v1541_v24  ;;  %v439_v34 = vadd.f32 %v438_v55, %v437_v50  ;;  %v491_v57 = vadd.f32 %v490_v8, %v363_v28 }
  0x53   :  { %v278_v30 = vadd.f32 %v277_v17, %v1548_v33  ;;  %v445_v62 = vadd.f32 %v444_v18, %v319_v45  ;;  %v492_v61 = vsel %vm177_vm0, %v364_v3, 0.0  ;;  %v322_v17 = vmul.f32 %v1327_v60, %v1327_v60  ;;  %v1595_v60 = vld [vmem:[#allocation2 + $0x3c8] sm:$0xff] }
  0x54   :  { %261 = vadd.xlane.f32.xlu1 %v260_v0  ;;  %v202_v39 = vadd.f32 %v201_v44, %v1550_v4  ;;  %v1576_v0 = vld [vmem:[#allocation2 + $0x3b8] sm:$0xff]  ;;  %v390_v55 = vmul.f32 %v1311_v59, %v1311_v59  ;;  %v391_v28 = vmul.f32 %v1313_v38, %v1313_v38  ;;  %v205_v45 = vsel %vm177_vm0, %v1564_v48, 0.0  ;;  %v1588_v44 = vld [vmem:[#allocation2 + $0x3c0] sm:$0xff] }
  0x55   :  { %v279_v51 = vadd.f32 %v278_v30, %v1557_v29  ;;  %v446_v15 = vadd.f32 %v445_v62, %v320_v36  ;;  %v323_v3 = vmul.f32 %v1345_v7, %v1345_v7  ;;  %v493_v30 = vadd.f32 %v492_v61, %v491_v57 }
  0x56   :  { %v203_v18 = vadd.f32 %v202_v39, %v1559_v35  ;;  %v392_v59 = vmul.f32 %v1322_v52, %v1322_v52  ;;  %v324_v62 = vmul.f32 %v1363_v14, %v1363_v14  ;;  %v325_v57 = vmul.f32 %v1381_v19, %v1381_v19  ;;  %v1602_v52 = vld [vmem:[#allocation2 + $0x3d0] sm:$0xff] }
  0x57   :  { %v280_v50 = vadd.f32 %v279_v51, %v1567_v32  ;;  %v447_v8 = vadd.f32 %v446_v15, %v321_v23  ;;  %v393_v23 = vmul.f32 %v1340_v11, %v1340_v11  ;;  %v523_v15 = vadd.f32 %v391_v28, %v390_v55  ;;  %v1611_v28 = vld [vmem:[#allocation2 + $0x3d8] sm:$0xff] }
  0x58   :  { %v204_v36 = vadd.f32 %v203_v18, %v1569_v31  ;;  %440 = vadd.xlane.f32.xlu1 %v439_v34  ;;  %v326_v11 = vmul.f32 %v1399_v27, %v1399_v27  ;;  %2356 = vst [vmem:[#allocation50_spill] sm:$0xff] %v1611_v28 }
  0x59   :  { %v281_v38 = vadd.f32 %v280_v50, %v1576_v0  ;;  %v448_v39 = vadd.f32 %v447_v8, %v322_v17  ;;  %v394_v17 = vmul.f32 %v1357_v22, %v1357_v22  ;;  %v524_v18 = vadd.f32 %v523_v15, %v392_v59 }
  0x5a   :  { %v206_v51 = vadd.f32 %v205_v45, %v204_v36  ;;  %v1606_v45 = vld [vmem:[#allocation2 + $0x3e0] sm:$0xff]  ;;  %v365_v36 = vmul.f32 %v1220_v40, %v1220_v40  ;;  %v366_v22 = vmul.f32 %v1222_v46, %v1222_v46  ;;  %v327_v59 = vmul.f32 %v1415_v10, %v1415_v10 }
  0x5b   :  { %v282_v34 = vadd.f32 %v281_v38, %v1588_v44  ;;  %v449_v61 = vadd.f32 %v448_v39, %v323_v3  ;;  %2355 = vst [vmem:[#allocation49_spill] sm:$0xff] %v1606_v45  ;;  %v395_v3 = vmul.f32 %v1375_v13, %v1375_v13  ;;  %v525_v8 = vadd.f32 %v524_v18, %v393_v23 }
  0x5c   :  { %207 = vadd.xlane.f32.xlu0 %v206_v51  ;;  %494 = vadd.xlane.f32.xlu1 %v493_v30  ;;  %v396_v39 = vmul.f32 %v1393_v20, %v1393_v20  ;;  %v367_v23 = vmul.f32 %v1224_v47, %v1224_v47  ;;  %v328_v46 = vmul.f32 %v1431_v2, %v1431_v2 }
  0x5d   :  { %v283_v50 = vadd.f32 %v282_v34, %v1595_v60  ;;  %v450_v55 = vadd.f32 %v449_v61, %v324_v62  ;;  %v286_v62 = vsel %vm177_vm0, %v1606_v45, 0.0  ;;  %v526_v51 = vadd.f32 %v525_v8, %v394_v17 }
  0x5e   :  { %v397_v34 = vmul.f32 %v1409_v41, %v1409_v41  ;;  %v368_v61 = vmul.f32 %v1230_v58, %v1230_v58  ;;  %v496_v18 = vadd.f32 %v366_v22, %v365_v36  ;;  %v329_v17 = vmul.f32 %v1448_v1, %v1448_v1  ;;  %v2357_v58 = vld [vmem:[#allocation39_spill] sm:$0xff] }
  0x5f   :  { %v284_v30 = vadd.f32 %v283_v50, %v1602_v52  ;;  %v451_v38 = vadd.f32 %v450_v55, %v325_v57  ;;  %v527_v57 = vadd.f32 %v526_v51, %v395_v3  ;;  %v398_v47 = vmul.f32 %v1425_v49, %v1425_v49 }
  0x60   :  { %v330_v3 = vmul.f32 %v1465_v26, %v1465_v26  ;;  %v399_v36 = vmul.f32 %v2357_v58, %v2357_v58 }
  0x61   :  { %v285_v40 = vadd.f32 %v284_v30, %v1611_v28  ;;  %v452_v15 = vadd.f32 %v451_v38, %v326_v11  ;;  %v528_v8 = vadd.f32 %v527_v57, %v396_v39  ;;  %v369_v11 = vmul.f32 %v1237_v6, %v1237_v6 }
  0x62   :  { %v497_v30 = vadd.f32 %v496_v18, %v367_v23  ;;  %v331_v39 = vmul.f32 %v1481_v54, %v1481_v54  ;;  %v400_v6 = vmul.f32 %v1459_v53, %v1459_v53  ;;  %v332_v18 = vmul.f32 %v1494_v25, %v1494_v25 }
  0x63   :  { %v287_v50 = vadd.f32 %v286_v62, %v285_v40  ;;  %v453_v55 = vadd.f32 %v452_v15, %v327_v59  ;;  %v529_v22 = vadd.f32 %v528_v8, %v397_v34  ;;  %v2358_v62 = vld [vmem:[#allocation8_spill] sm:$0xff]  ;;  %v2359_v15 = vld [vmem:[#allocation9_spill] sm:$0xff] }
  0x64   :  { %v370_v59 = vmul.f32 %v2358_v62, %v2358_v62  ;;  %v498_v51 = vadd.f32 %v497_v30, %v368_v61  ;;  %v371_v57 = vmul.f32 %v2359_v15, %v2359_v15  ;;  %v333_v30 = vmul.f32 %v1509_v21, %v1509_v21 }
  0x65   :  { %288 = vadd.xlane.f32.xlu0 %v287_v50  ;;  %v454_v38 = vadd.f32 %v453_v55, %v328_v46  ;;  %v530_v23 = vadd.f32 %v529_v22, %v398_v47  ;;  %v401_v50 = vmul.f32 %v1476_v42, %v1476_v42  ;;  %v2360_v55 = vld [vmem:[#allocation11_spill] sm:$0xff]  ;;  %v2361_v22 = vld [vmem:[#allocation13_spill] sm:$0xff] }
  0x66   :  { %v499_v46 = vadd.f32 %v498_v51, %v369_v11  ;;  %v372_v8 = vmul.f32 %v2360_v55, %v2360_v55  ;;  %v373_v62 = vmul.f32 %v2361_v22, %v2361_v22  ;;  %v334_v51 = vmul.f32 %v1526_v12, %v1526_v12 }
  0x67   :  { %v455_v40 = vadd.f32 %v454_v38, %v329_v17  ;;  %v531_v61 = vadd.f32 %v530_v23, %v399_v36  ;;  %v402_v38 = vmul.f32 %v1490_v56, %v1490_v56  ;;  %v2362_v23 = vld [vmem:[#allocation16_spill] sm:$0xff] }
  0x68   :  { %v500_v17 = vadd.f32 %v499_v46, %v370_v59  ;;  %v374_v15 = vmul.f32 %v2362_v23, %v2362_v23  ;;  %v335_v46 = vmul.f32 %v1541_v24, %v1541_v24 }
  0x69   :  { %v456_v34 = vadd.f32 %v455_v40, %v330_v3  ;;  %v532_v11 = vadd.f32 %v531_v61, %v400_v6  ;;  %v403_v40 = vmul.f32 %v1505_v43, %v1505_v43  ;;  %v2363_v61 = vld [vmem:[#allocation18_spill] sm:$0xff] }
  0x6a   :  { %v501_v3 = vadd.f32 %v500_v17, %v371_v57  ;;  %v375_v55 = vmul.f32 %v2363_v61, %v2363_v61  ;;  %v336_v17 = vmul.f32 %v1550_v4, %v1550_v4  ;;  %v2366_v61 = vld [vmem:[#allocation27_spill] sm:$0xff] }
  0x6b   :  { %v457_v47 = vadd.f32 %v456_v34, %v331_v39  ;;  %v533_v59 = vadd.f32 %v532_v11, %v401_v50  ;;  %v404_v34 = vmul.f32 %v1522_v5, %v1522_v5  ;;  %v2364_v11 = vld [vmem:[#allocation20_spill] sm:$0xff] }
  0x6c   :  { %v502_v39 = vadd.f32 %v501_v3, %v372_v8  ;;  %v376_v22 = vmul.f32 %v2364_v11, %v2364_v11  ;;  %v337_v3 = vmul.f32 %v1559_v35, %v1559_v35 }
  0x6d   :  { %v458_v36 = vadd.f32 %v457_v47, %v332_v18  ;;  %v534_v57 = vadd.f32 %v533_v59, %v402_v38  ;;  %v405_v47 = vmul.f32 %v1535_v9, %v1535_v9  ;;  %v339_v38 = vmul.f32 %v1564_v48, %v1564_v48 }
  0x6e   :  { %v503_v18 = vadd.f32 %v502_v39, %v373_v62  ;;  %v406_v62 = vmul.f32 %v1548_v33, %v1548_v33 }
  0x6f   :  { %v459_v6 = vadd.f32 %v458_v36, %v333_v30  ;;  %v535_v8 = vadd.f32 %v534_v57, %v403_v40  ;;  %v338_v40 = vmul.f32 %v1569_v31, %v1569_v31  ;;  %v465_v11 = vsel %vm177_vm0, %v339_v38, 0.0 }
  0x70   :  { %v504_v30 = vadd.f32 %v503_v18, %v374_v15  ;;  %v407_v15 = vmul.f32 %v1557_v29, %v1557_v29  ;;  %v378_v18 = vmul.f32 %v2366_v61, %v2366_v61  ;;  %v410_v38 = vmul.f32 %v1588_v44, %v1588_v44 }
  0x71   :  { %v460_v50 = vadd.f32 %v459_v6, %v334_v51  ;;  %v536_v59 = vadd.f32 %v535_v8, %v404_v34  ;;  %v2365_v51 = vld [vmem:[#allocation24_spill] sm:$0xff]  ;;  %v408_v34 = vmul.f32 %v1567_v32, %v1567_v32 }
  0x72   :  { %v377_v23 = vmul.f32 %v2365_v51, %v2365_v51  ;;  %v505_v39 = vadd.f32 %v504_v30, %v375_v55  ;;  %v2367_v55 = vld [vmem:[#allocation30_spill] sm:$0xff] }
  0x73   :  { %v461_v36 = vadd.f32 %v460_v50, %v335_v46  ;;  %v537_v57 = vadd.f32 %v536_v59, %v405_v47  ;;  %v379_v30 = vmul.f32 %v2367_v55, %v2367_v55  ;;  %v2368_v59 = vld [vmem:[#allocation33_spill] sm:$0xff] }
  0x74   :  { %v506_v46 = vadd.f32 %v505_v39, %v376_v22  ;;  %v380_v29 = vmul.f32 %v2368_v59, %v2368_v59 }
  0x75   :  { %v462_v6 = vadd.f32 %v461_v36, %v336_v17  ;;  %v538_v8 = vadd.f32 %v537_v57, %v406_v62  ;;  %v409_v36 = vmul.f32 %v1576_v0, %v1576_v0 }
  0x76   :  { %v507_v51 = vadd.f32 %v506_v46, %v377_v23  ;;  %v411_v23 = vmul.f32 %v1595_v60, %v1595_v60  ;;  %v2370_v46 = vld [vmem:[#allocation37_spill] sm:$0xff] }
  0x77   :  { %v463_v50 = vadd.f32 %v462_v6, %v337_v3  ;;  %v539_v47 = vadd.f32 %v538_v8, %v407_v15  ;;  %v2369_v6 = vld [vmem:[#allocation35_spill] sm:$0xff]  ;;  %v382_v15 = vmul.f32 %v2370_v46, %v2370_v46  ;;  %v2371_v8 = vld [vmem:[#allocation41_spill] sm:$0xff] }
  0x78   :  { %v508_v22 = vadd.f32 %v507_v51, %v378_v18  ;;  %v381_v62 = vmul.f32 %v2369_v6, %v2369_v6  ;;  %v412_v18 = vmul.f32 %v1602_v52, %v1602_v52 }
  0x79   :  { %v464_v17 = vadd.f32 %v463_v50, %v338_v40  ;;  %v540_v39 = vadd.f32 %v539_v47, %v408_v34  ;;  %v383_v34 = vmul.f32 %v2371_v8, %v2371_v8 }
  0x7a   :  { %v509_v57 = vadd.f32 %v508_v22, %v379_v30  ;;  %v414_v30 = vmul.f32 %v1606_v45, %v1606_v45  ;;  %v2375_v45 = vld [vmem:[#allocation46_spill] sm:$0xff] }
  0x7b   :  { %v466_v3 = vadd.f32 %v465_v11, %v464_v17  ;;  %v541_v40 = vadd.f32 %v540_v39, %v409_v36  ;;  %v413_v17 = vmul.f32 %v1611_v28, %v1611_v28  ;;  %v2372_v36 = vld [vmem:[#allocation43_spill] sm:$0xff]  ;;  %v2373_v39 = vld [vmem:[#allocation44_spill] sm:$0xff] }
  0x7c   :  { %v510_v50 = vadd.f32 %v509_v57, %v380_v29  ;;  %v384_v22 = vmul.f32 %v2372_v36, %v2372_v36  ;;  %v385_v6 = vmul.f32 %v2373_v39, %v2373_v39  ;;  %v546_v57 = vsel %vm177_vm0, %v414_v30, 0.0  ;;  %v2376_v28 = vld [vmem:[#allocation47_spill] sm:$0xff] }
  0x7d   :  { %467 = vadd.xlane.f32.xlu0 %v466_v3  ;;  %v542_v11 = vadd.f32 %v541_v40, %v410_v38  ;;  %v1183_v36 = vmov 0  }
  0x7e   :  { %v511_v51 = vadd.f32 %v510_v50, %v381_v62  ;;  %v2374_v62 = vld [vmem:[#allocation45_spill] sm:$0xff]  ;;  %1057 = vset.pattern.permute.xlu0 %v1183_v36  ;;  %1058 = vset.pattern.permute.xlu1 %v1183_v36 }
  0x7f   :  { %v543_v47 = vadd.f32 %v542_v11, %v411_v23  ;;  %v386_v46 = vmul.f32 %v2374_v62, %v2374_v62  ;;  %v387_v23 = vmul.f32 %v2375_v45, %v2375_v45 }
  0x80   :  { %v512_v3 = vadd.f32 %v511_v51, %v382_v15  ;;  %v389_v15 = vmul.f32 %v2376_v28, %v2376_v28 }
  0x81   :  { %v544_v29 = vadd.f32 %v543_v47, %v412_v18  ;;  %v388_v18 = vmul.f32 %v1524_v63, %v1524_v63 }
  0x82   :  { %v513_v38 = vadd.f32 %v512_v3, %v383_v34  ;;  %v519_v30 = vsel %vm177_vm0, %v389_v15, 0.0 }
  0x83   :  { %v545_v40 = vadd.f32 %v544_v29, %v413_v17 }
  0x84   :  { %v514_v50 = vadd.f32 %v513_v38, %v384_v22 }
  0x85   :  { %v547_v8 = vadd.f32 %v546_v57, %v545_v40  ;;  %v585_v40 = vld [vmem:[%s2262_s1] sm:$0xff] }
  0x86   :  { %v515_v11 = vadd.f32 %v514_v50, %v385_v6 }
  0x87   :  { %548 = vadd.xlane.f32.xlu1 %v547_v8 }
  0x88   :  { %v516_v34 = vadd.f32 %v515_v11, %v386_v46 }
  0x8a   :  { %v517_v51 = vadd.f32 %v516_v34, %v387_v23 }
  0x8c   :  { %v518_v17 = vadd.f32 %v517_v51, %v388_v18 }
  0x8e   :  { %v520_v47 = vadd.f32 %v519_v30, %v518_v17 }
  0x90   :  { %521 = vadd.xlane.f32.xlu0 %v520_v47 }
  0xd1   :  { %v235_v22 = vpop.xlane.xlu1 %234 }
  0xd2   :  { %v552_v23 = vmul.f32 0.00031887754, %v235_v22 }
  0xd4   :  { %v562_v18 = vmul.f32 %v552_v23, %v552_v23 }
  0xd7   :  { %v181_v45 = vpop.xlane.xlu0 %180 }
  0xd8   :  { %v1736_v29 = vmul.f32 0.00031887754, %v181_v45 }
  0xda   :  { %v560_v39 = vmul.f32 %v1736_v29, %v1736_v29 }
  0xe1   :  { %v262_v3 = vpop.xlane.xlu1 %261 }
  0xe5   :  { %v441_v28 = vpop.xlane.xlu1 %440 }
  0xe6   :  { %v555_v63 = vmul.f32 0.00031887754, %v441_v28 }
  0xe8   :  { %v565_v6 = vsub.f32 %v555_v63, %v560_v39 }
  0xe9   :  { %v208_v50 = vpop.xlane.xlu0 %207  ;;  %v495_v8 = vpop.xlane.xlu1 %494 }
  0xea   :  { %v570_v38 = vmax.f32 %v565_v6, 0.0  ;;  %v557_v15 = vmul.f32 0.00031887754, %v495_v8  ;;  %v551_v34 = vmul.f32 0.00031887754, %v208_v50 }
  0xeb   :  { %v553_v50 = vmul.f32 0.00031887754, %v262_v3  ;;  %v589_v3 = vld [vmem:[%s2262_s1 + $0x20] sm:$0xff] }
  0xec   :  { %v575_v57 = vadd.f32 0.001, %v570_v38  ;;  %v567_v51 = vsub.f32 %v557_v15, %v562_v18  ;;  %v561_v17 = vmul.f32 %v551_v34, %v551_v34 }
  0xee   :  { %1059 = vrsqrt.f32 %v575_v57  ;;  %v572_v36 = vmax.f32 %v567_v51, 0.0 }
  0xf0   :  { %v577_v39 = vadd.f32 0.001, %v572_v36 }
  0xf2   :  { %v289_v11 = vpop.xlane.xlu0 %288 }
  0xf3   :  { %v554_v6 = vmul.f32 0.00031887754, %v289_v11  ;;  %v587_v11 = vld [vmem:[%s2262_s1 + $0x10] sm:$0xff] }
  0xf5   :  { %v564_v57 = vmul.f32 %v554_v6, %v554_v6 }
  0xf8   :  { %v1060_v62 = vpop.eup %1059 }
  0xf9   :  { %v590_v46 = vmul.f32 %v1060_v62, %v585_v40  ;;  %v586_v62 = vld [vmem:[%s2262_s1 + $0x8] sm:$0xff] }
  0xfb   :  { %612 = vperm.xlu0 %1057, %v590_v46  }
 0x10a   :  { %v468_v30 = vpop.xlane.xlu0 %467 }
 0x10b   :  { %v556_v47 = vmul.f32 0.00031887754, %v468_v30 }
 0x10d   :  { %v566_v45 = vsub.f32 %v556_v47, %v561_v17  ;;  %v563_v47 = vmul.f32 %v553_v50, %v553_v50 }
 0x10f   :  { %v571_v28 = vmax.f32 %v566_v45, 0.0 }
 0x111   :  { %v576_v63 = vadd.f32 0.001, %v571_v28 }
 0x113   :  { %1061 = vrsqrt.f32 %v576_v63 }
 0x114   :  { %1063 = vrsqrt.f32 %v577_v39  ;;  %v549_v38 = vpop.xlane.xlu1 %548 }
 0x115   :  { %v559_v40 = vmul.f32 0.00031887754, %v549_v38 }
 0x117   :  { %v569_v22 = vsub.f32 %v559_v40, %v564_v57  ;;  %v599_v40 = vld [vmem:[%s2263_s2 + $0x20] sm:$0xff] }
 0x119   :  { %v574_v8 = vmax.f32 %v569_v22, 0.0 }
 0x11b   :  { %v579_v18 = vadd.f32 0.001, %v574_v8  ;;  %v588_v8 = vld [vmem:[%s2262_s1 + $0x18] sm:$0xff] }
 0x11d   :  { %v1062_v15 = vpop.eup %1061  ;;  %v522_v17 = vpop.xlane.xlu0 %521  ;;  %1065 = vrsqrt.f32 %v579_v18 }
 0x11e   :  { %v591_v51 = vmul.f32 %v1062_v15, %v586_v62  ;;  %v1064_v30 = vpop.eup %1063  ;;  %v558_v36 = vmul.f32 0.00031887754, %v522_v17  ;;  %v595_v17 = vld [vmem:[%s2263_s2] sm:$0xff] }
 0x11f   :  { %v592_v28 = vmul.f32 %v1064_v30, %v587_v11  ;;  %v600_v30 = vmul.f32 %v590_v46, %v1736_v29 }
 0x120   :  { %617 = vperm.xlu1 %1058, %v591_v51   ;;  %v568_v45 = vsub.f32 %v558_v36, %v563_v47  ;;  %v601_v47 = vmul.f32 %v591_v51, %v551_v34 }
 0x121   :  { %v605_v11 = vsub.f32 %v595_v17, %v600_v30  ;;  %v1075_v30 = vld [vmem:[#allocation2 + $0x30] sm:$0xff] }
 0x122   :  { %v573_v39 = vmax.f32 %v568_v45, 0.0  ;;  %v602_v45 = vmul.f32 %v592_v28, %v552_v23 }
 0x124   :  { %622 = vperm.xlu1 %1058, %v592_v28   ;;  %v578_v63 = vadd.f32 0.001, %v573_v39  ;;  %v597_v39 = vld [vmem:[%s2263_s2 + $0x10] sm:$0xff] }
 0x125   :  { %v607_v29 = vsub.f32 %v597_v39, %v602_v45  ;;  %v1071_v28 = vld [vmem:[#allocation2 + $0x10] sm:$0xff]  ;;  %v1078_v45 = vld [vmem:[#allocation2 + $0x48] sm:$0xff] }
 0x126   :  { %1067 = vrsqrt.f32 %v578_v63  ;;  %v598_v63 = vld [vmem:[%s2263_s2 + $0x18] sm:$0xff] }
 0x127   :  { %v1066_v38 = vpop.eup %1065 }
 0x128   :  { %v594_v57 = vmul.f32 %v1066_v38, %v589_v3  ;;  %v1069_v3 = vld [vmem:[#allocation2] sm:$0xff] }
 0x12a   :  { %v604_v22 = vmul.f32 %v594_v57, %v554_v6  ;;  %v596_v6 = vld [vmem:[%s2263_s2 + $0x8] sm:$0xff]  ;;  %s1184_s2 = smov [#allocation5]  }
 0x12b   :  { %v606_v36 = vsub.f32 %v596_v6, %v601_v47  ;;  %v1077_v6 = vld [vmem:[#allocation2 + $0x40] sm:$0xff]  ;;  %s1040_s17 = sshll.u32 %s1184_s2, 4  ;;  %s1041_s17 = int_to_ptr.vmem [resolvable:$true] %s1040_s17 }
 0x12c   :  { %v609_v62 = vsub.f32 %v599_v40, %v604_v22  ;;  %v1072_v22 = vld [vmem:[#allocation2 + $0x18] sm:$0xff]  ;;  %s1154_s18 = scalar_lea.vmem %s1041_s17, 16000  ;;  %p1159_p9 = scmp.lt.s32.totalorder %s1041_s17, %s1041_s17 }
 0x12d   :  { %p1155_p8 = scmp.ne.s32.totalorder %s1041_s17, %s1154_s18  ;;  %p1160_p10 = scmp.lt.s32.totalorder %s1154_s18, %s1154_s18 }
 0x12e   :  { %782 = vperm.xlu0 %1057, %v609_v62  }
 0x12f   :  { %p1161_p11 = por %p1160_p10, %p1159_p9 }
 0x130   :  { %v1068_v15 = vpop.eup %1067 }
 0x131   :  { %v593_v18 = vmul.f32 %v1068_v15, %v588_v8  ;;  %v1074_v15 = vld [vmem:[#allocation2 + $0x28] sm:$0xff]  ;;  %p1162_p12 = pnand %p1161_p11, %p1155_p8 }
 0x133   :  { %627 = vperm.xlu1 %1058, %v593_v18   ;;  %v603_v46 = vmul.f32 %v593_v18, %v553_v50  ;;  %v1073_v50 = vld [vmem:[#allocation2 + $0x20] sm:$0xff] }
 0x135   :  { %v608_v34 = vsub.f32 %v598_v63, %v603_v46  ;;  %v2379_v63 = vld [vmem:[#allocation10_spill] sm:$0xff] }
 0x137   :  { %632 = vperm.xlu1 %1058, %v594_v57   ;;  %v1070_v57 = vld [vmem:[#allocation2 + $0x8] sm:$0xff] }
 0x13b   :  { %762 = vperm.xlu1 %1058, %v605_v11   ;;  %v1076_v11 = vld [vmem:[#allocation2 + $0x38] sm:$0xff] }
 0x13f   :  { %767 = vperm.xlu1 %1058, %v606_v36  }
 0x143   :  { %772 = vperm.xlu1 %1058, %v607_v29   ;;  %v1079_v29 = vld [vmem:[#allocation2 + $0x50] sm:$0xff] }
 0x147   :  { %777 = vperm.xlu1 %1058, %v608_v34  }
 0x17a   :  { %v613_v51 = vpop.permute.xlu0 %612 }
 0x17b   :  { %v1771_v38 = vmul.f32 %v1069_v3, %v613_v51  ;;  %v1773_v23 = vmul.f32 %v1070_v57, %v613_v51  ;;  %v1775_v40 = vmul.f32 %v1071_v28, %v613_v51  ;;  %v1777_v62 = vmul.f32 %v1072_v22, %v613_v51  ;;  %v2381_v3 = vld [vmem:[#allocation12_spill] sm:$0xff]  ;;  %v2383_v28 = vld [vmem:[#allocation15_spill] sm:$0xff] }
 0x17c   :  { %v1779_v8 = vmul.f32 %v1073_v50, %v613_v51  ;;  %v1781_v18 = vmul.f32 %v1074_v15, %v613_v51  ;;  %v1783_v17 = vmul.f32 %v1075_v30, %v613_v51  ;;  %v1785_v47 = vmul.f32 %v1076_v11, %v613_v51  ;;  %v2385_v50 = vld [vmem:[#allocation17_spill] sm:$0xff]  ;;  %v2387_v11 = vld [vmem:[#allocation19_spill] sm:$0xff] }
 0x17d   :  { %v1787_v36 = vmul.f32 %v1077_v6, %v613_v51  ;;  %v1789_v39 = vmul.f32 %v1078_v45, %v613_v51  ;;  %v1791_v46 = vmul.f32 %v1079_v29, %v613_v51  ;;  %v1794_v34 = vmul.f32 %v613_v51, %v2379_v63  ;;  %v2389_v45 = vld [vmem:[#allocation23_spill] sm:$0xff]  ;;  %v2391_v29 = vld [vmem:[#allocation26_spill] sm:$0xff]  ;;  %v2393_v63 = vld [vmem:[#allocation29_spill] sm:$0xff] }
 0x17e   :  { %v1797_v57 = vmul.f32 %v613_v51, %v2381_v3  ;;  %v1800_v22 = vmul.f32 %v613_v51, %v2383_v28  ;;  %v1803_v15 = vmul.f32 %v613_v51, %v2385_v50  ;;  %v1806_v6 = vmul.f32 %v613_v51, %v2387_v11  ;;  %v2395_v3 = vld [vmem:[#allocation32_spill] sm:$0xff]  ;;  %v2397_v28 = vld [vmem:[#allocation34_spill] sm:$0xff] }
 0x17f   :  { %2377 = vst [vmem:[#allocation39_spill] sm:$0xff] %v1789_v39  ;;  %2378 = vst [vmem:[#allocation8_spill] sm:$0xff] %v1791_v46  ;;  %v1809_v39 = vmul.f32 %v613_v51, %v2389_v45  ;;  %v1812_v46 = vmul.f32 %v613_v51, %v2391_v29  ;;  %v2399_v50 = vld [vmem:[#allocation36_spill] sm:$0xff]  ;;  %v2401_v11 = vld [vmem:[#allocation38_spill] sm:$0xff] }
 0x180   :  { %2380 = vst [vmem:[#allocation9_spill] sm:$0xff] %v1794_v34  ;;  %2382 = vst [vmem:[#allocation11_spill] sm:$0xff] %v1797_v57  ;;  %v1815_v34 = vmul.f32 %v613_v51, %v2393_v63  ;;  %v1818_v57 = vmul.f32 %v613_v51, %v2395_v3  ;;  %v2403_v45 = vld [vmem:[#allocation42_spill] sm:$0xff]  ;;  %v2404_v29 = vld [vmem:[#allocation40_spill] sm:$0xff] }
 0x181   :  { %2384 = vst [vmem:[#allocation13_spill] sm:$0xff] %v1800_v22  ;;  %2386 = vst [vmem:[#allocation16_spill] sm:$0xff] %v1803_v15  ;;  %v1821_v22 = vmul.f32 %v613_v51, %v2397_v28  ;;  %v1824_v15 = vmul.f32 %v613_v51, %v2399_v50  ;;  %v1080_v63 = vld [vmem:[#allocation2 + $0xc8] sm:$0xff]  ;;  %v1081_v3 = vld [vmem:[#allocation2 + $0xd0] sm:$0xff] }
 0x182   :  { %2388 = vst [vmem:[#allocation18_spill] sm:$0xff] %v1806_v6  ;;  %2390 = vst [vmem:[#allocation20_spill] sm:$0xff] %v1809_v39  ;;  %v1827_v6 = vmul.f32 %v613_v51, %v2401_v11  ;;  %v1830_v39 = vmul.f32 %v613_v51, %v2403_v45  ;;  %v1082_v28 = vld [vmem:[#allocation2 + $0xd8] sm:$0xff]  ;;  %v1083_v50 = vld [vmem:[#allocation2 + $0xe0] sm:$0xff] }
 0x183   :  { %2392 = vst [vmem:[#allocation24_spill] sm:$0xff] %v1812_v46  ;;  %2394 = vst [vmem:[#allocation27_spill] sm:$0xff] %v1815_v34  ;;  %v1833_v46 = vmul.f32 %v613_v51, %v2404_v29  ;;  %v2405_v11 = vld [vmem:[#allocation14_spill] sm:$0xff]  ;;  %v2406_v29 = vld [vmem:[#allocation21_spill] sm:$0xff] }
 0x184   :  { %2396 = vst [vmem:[#allocation30_spill] sm:$0xff] %v1818_v57  ;;  %2398 = vst [vmem:[#allocation33_spill] sm:$0xff] %v1821_v22 }
 0x185   :  { %2400 = vst [vmem:[#allocation35_spill] sm:$0xff] %v1824_v15  ;;  %2402 = vst [vmem:[#allocation37_spill] sm:$0xff] %v1827_v6 }
 0x19f   :  { %v618_v30 = vpop.permute.xlu1 %617 }
 0x1a0   :  { %v1835_v34 = vmul.f32 %v1080_v63, %v618_v30  ;;  %v1837_v57 = vmul.f32 %v1081_v3, %v618_v30  ;;  %v1839_v22 = vmul.f32 %v1082_v28, %v618_v30  ;;  %v1841_v15 = vmul.f32 %v1083_v50, %v618_v30 }
 0x1a1   :  { %v1844_v6 = vmul.f32 %v618_v30, %v2405_v11  ;;  %v1847_v45 = vmul.f32 %v618_v30, %v1293_v16  ;;  %v1850_v51 = vmul.f32 %v618_v30, %v1309_v37  ;;  %v1853_v63 = vmul.f32 %v618_v30, %v2406_v29 }
 0x1a2   :  { %v1856_v3 = vmul.f32 %v618_v30, %v1345_v7  ;;  %v1859_v28 = vmul.f32 %v618_v30, %v1363_v14  ;;  %v1862_v50 = vmul.f32 %v618_v30, %v1381_v19  ;;  %v1865_v11 = vmul.f32 %v618_v30, %v1399_v27 }
 0x1a3   :  { %2407 = vst [vmem:[#allocation41_spill] sm:$0xff] %v1853_v63  ;;  %v1868_v16 = vmul.f32 %v618_v30, %v1415_v10  ;;  %v1871_v37 = vmul.f32 %v618_v30, %v1431_v2  ;;  %v623_v29 = vpop.permute.xlu1 %622  ;;  %v1874_v63 = vmul.f32 %v618_v30, %v1448_v1  ;;  %v1877_v7 = vmul.f32 %v618_v30, %v1465_v26 }
 0x1a4   :  { %2408 = vst [vmem:[#allocation43_spill] sm:$0xff] %v1865_v11  ;;  %v1880_v14 = vmul.f32 %v618_v30, %v1481_v54  ;;  %v1883_v19 = vmul.f32 %v618_v30, %v1494_v25  ;;  %v1886_v27 = vmul.f32 %v618_v30, %v1509_v21  ;;  %v1889_v10 = vmul.f32 %v618_v30, %v1526_v12  ;;  %v1084_v21 = vld [vmem:[#allocation2 + $0x190] sm:$0xff]  ;;  %v1085_v12 = vld [vmem:[#allocation2 + $0x198] sm:$0xff] }
 0x1a5   :  { %2409 = vst [vmem:[#allocation44_spill] sm:$0xff] %v1868_v16  ;;  %2410 = vst [vmem:[#allocation45_spill] sm:$0xff] %v1871_v37  ;;  %v1892_v2 = vmul.f32 %v618_v30, %v1541_v24  ;;  %v1895_v1 = vmul.f32 %v618_v30, %v1550_v4  ;;  %v1898_v26 = vmul.f32 %v618_v30, %v1559_v35  ;;  %v1086_v24 = vld [vmem:[#allocation2 + $0x1a0] sm:$0xff]  ;;  %v1087_v4 = vld [vmem:[#allocation2 + $0x1a8] sm:$0xff] }
 0x1a6   :  { %2411 = vst [vmem:[#allocation46_spill] sm:$0xff] %v1874_v63  ;;  %2412 = vst [vmem:[#allocation47_spill] sm:$0xff] %v1877_v7  ;;  %v1901_v54 = vmul.f32 %v618_v30, %v1569_v31  ;;  %v1904_v25 = vmul.f32 %v618_v30, %v1564_v48  ;;  %v1088_v35 = vld [vmem:[#allocation2 + $0x1b0] sm:$0xff]  ;;  %v1089_v31 = vld [vmem:[#allocation2 + $0x1b8] sm:$0xff] }
 0x1a7   :  { %2413 = vst [vmem:[#allocation10_spill] sm:$0xff] %v1880_v14  ;;  %2414 = vst [vmem:[#allocation12_spill] sm:$0xff] %v1883_v19  ;;  %v1090_v48 = vld [vmem:[#allocation2 + $0x1c0] sm:$0xff] }
 0x1a8   :  { %2415 = vst [vmem:[#allocation15_spill] sm:$0xff] %v1886_v27  ;;  %2416 = vst [vmem:[#allocation17_spill] sm:$0xff] %v1889_v10  ;;  %v1906_v27 = vmul.f32 %v1084_v21, %v623_v29  ;;  %v1908_v10 = vmul.f32 %v1085_v12, %v623_v29  ;;  %v1918_v30 = vmul.f32 %v1090_v48, %v623_v29  ;;  %v1091_v21 = vld [vmem:[#allocation2 + $0x1c8] sm:$0xff]  ;;  %v1092_v12 = vld [vmem:[#allocation2 + $0x1d0] sm:$0xff] }
 0x1a9   :  { %2417 = vst [vmem:[#allocation19_spill] sm:$0xff] %v1892_v2  ;;  %2418 = vst [vmem:[#allocation23_spill] sm:$0xff] %v1895_v1  ;;  %v1910_v2 = vmul.f32 %v1086_v24, %v623_v29  ;;  %v1912_v1 = vmul.f32 %v1087_v4, %v623_v29  ;;  %v1093_v24 = vld [vmem:[#allocation2 + $0x1d8] sm:$0xff]  ;;  %v1094_v4 = vld [vmem:[#allocation2 + $0x1e0] sm:$0xff] }
 0x1aa   :  { %2419 = vst [vmem:[#allocation26_spill] sm:$0xff] %v1898_v26  ;;  %2420 = vst [vmem:[#allocation29_spill] sm:$0xff] %v1901_v54  ;;  %v1914_v26 = vmul.f32 %v1088_v35, %v623_v29  ;;  %v1916_v54 = vmul.f32 %v1089_v31, %v623_v29  ;;  %v1095_v35 = vld [vmem:[#allocation2 + $0x1e8] sm:$0xff]  ;;  %v1096_v31 = vld [vmem:[#allocation2 + $0x1f0] sm:$0xff] }
 0x1ab   :  { %2421 = vst [vmem:[#allocation32_spill] sm:$0xff] %v1904_v25  ;;  %2422 = vst [vmem:[#allocation34_spill] sm:$0xff] %v1906_v27  ;;  %v1920_v27 = vmul.f32 %v1091_v21, %v623_v29  ;;  %v1097_v48 = vld [vmem:[#allocation2 + $0x1f8] sm:$0xff]  ;;  %v1098_v21 = vld [vmem:[#allocation2 + $0x200] sm:$0xff] }
 0x1ac   :  { %2423 = vst [vmem:[#allocation36_spill] sm:$0xff] %v1908_v10  ;;  %2424 = vst [vmem:[#allocation38_spill] sm:$0xff] %v1910_v2  ;;  %v1922_v10 = vmul.f32 %v1092_v12, %v623_v29  ;;  %v1924_v2 = vmul.f32 %v1093_v24, %v623_v29  ;;  %v1099_v12 = vld [vmem:[#allocation2 + $0x208] sm:$0xff]  ;;  %v1100_v24 = vld [vmem:[#allocation2 + $0x210] sm:$0xff] }
 0x1ad   :  { %2425 = vst [vmem:[#allocation42_spill] sm:$0xff] %v1912_v1  ;;  %2426 = vst [vmem:[#allocation40_spill] sm:$0xff] %v1914_v26  ;;  %v1926_v1 = vmul.f32 %v1094_v4, %v623_v29  ;;  %v1928_v26 = vmul.f32 %v1095_v35, %v623_v29  ;;  %v1101_v4 = vld [vmem:[#allocation2 + $0x218] sm:$0xff]  ;;  %v1102_v35 = vld [vmem:[#allocation2 + $0x220] sm:$0xff] }
 0x1ae   :  { %2427 = vst [vmem:[#allocation14_spill] sm:$0xff] %v1916_v54  ;;  %2428 = vst [vmem:[#allocation21_spill] sm:$0xff] %v1918_v30  ;;  %v1930_v54 = vmul.f32 %v1096_v31, %v623_v29  ;;  %v1932_v30 = vmul.f32 %v1097_v48, %v623_v29  ;;  %v1103_v31 = vld [vmem:[#allocation2 + $0x228] sm:$0xff]  ;;  %v2442_v48 = vld [vmem:[#allocation22_spill] sm:$0xff] }
 0x1af   :  { %2429 = vst [vmem:[#allocation51_spill] sm:$0xff] %v1920_v27  ;;  %2430 = vst [vmem:[#allocation52_spill] sm:$0xff] %v1922_v10  ;;  %v1934_v27 = vmul.f32 %v1098_v21, %v623_v29  ;;  %v1936_v10 = vmul.f32 %v1099_v12, %v623_v29  ;;  %v2444_v21 = vld [vmem:[#allocation25_spill] sm:$0xff]  ;;  %v2446_v12 = vld [vmem:[#allocation28_spill] sm:$0xff] }
 0x1b0   :  { %2431 = vst [vmem:[#allocation53_spill] sm:$0xff] %v1924_v2  ;;  %2432 = vst [vmem:[#allocation54_spill] sm:$0xff] %v1926_v1  ;;  %v1938_v2 = vmul.f32 %v1100_v24, %v623_v29  ;;  %v1940_v1 = vmul.f32 %v1101_v4, %v623_v29  ;;  %v2448_v24 = vld [vmem:[#allocation31_spill] sm:$0xff]  ;;  %v1104_v4 = vld [vmem:[#allocation2 + $0x250] sm:$0xff] }
 0x1b1   :  { %2433 = vst [vmem:[#allocation55_spill] sm:$0xff] %v1928_v26  ;;  %2434 = vst [vmem:[#allocation56_spill] sm:$0xff] %v1930_v54  ;;  %v1942_v26 = vmul.f32 %v1102_v35, %v623_v29  ;;  %v1944_v54 = vmul.f32 %v1103_v31, %v623_v29 }
 0x1b2   :  { %2435 = vst [vmem:[#allocation57_spill] sm:$0xff] %v1932_v30  ;;  %2436 = vst [vmem:[#allocation58_spill] sm:$0xff] %v1934_v27  ;;  %v1947_v30 = vmul.f32 %v623_v29, %v2442_v48  ;;  %v1950_v27 = vmul.f32 %v623_v29, %v2444_v21  ;;  %v1960_v35 = vpop.permute.xlu1 %627  ;;  %v1106_v48 = vld [vmem:[#allocation2 + $0x260] sm:$0xff]  ;;  %v1107_v21 = vld [vmem:[#allocation2 + $0x268] sm:$0xff] }
 0x1b3   :  { %2437 = vst [vmem:[#allocation59_spill] sm:$0xff] %v1936_v10  ;;  %2438 = vst [vmem:[#allocation60_spill] sm:$0xff] %v1938_v2  ;;  %v1953_v10 = vmul.f32 %v623_v29, %v2446_v12  ;;  %v1956_v2 = vmul.f32 %v623_v29, %v2448_v24  ;;  %v1969_v12 = vmul.f32 %v1107_v21, %v1960_v35 }
 0x1b4   :  { %2439 = vst [vmem:[#allocation61_spill] sm:$0xff] %v1940_v1  ;;  %2440 = vst [vmem:[#allocation62_spill] sm:$0xff] %v1942_v26  ;;  %v1958_v1 = vmul.f32 %v1104_v4, %v623_v29  ;;  %v1105_v26 = vld [vmem:[#allocation2 + $0x258] sm:$0xff] }
 0x1b5   :  { %2441 = vst [vmem:[#allocation63_spill] sm:$0xff] %v1944_v54  ;;  %2443 = vst [vmem:[#allocation22_spill] sm:$0xff] %v1947_v30  ;;  %v1963_v31 = vmul.f32 %v1105_v26, %v1960_v35  ;;  %v1966_v30 = vmul.f32 %v1106_v48, %v1960_v35  ;;  %v1109_v29 = vld [vmem:[#allocation2 + $0x278] sm:$0xff] }
 0x1b6   :  { %2445 = vst [vmem:[#allocation25_spill] sm:$0xff] %v1950_v27  ;;  %2447 = vst [vmem:[#allocation28_spill] sm:$0xff] %v1953_v10  ;;  %v1108_v10 = vld [vmem:[#allocation2 + $0x270] sm:$0xff]  ;;  %v1975_v4 = vmul.f32 %v1109_v29, %v1960_v35  ;;  %v1122_v27 = vld [vmem:[#allocation2 + $0x340] sm:$0xff] }
 0x1b7   :  { %2449 = vst [vmem:[#allocation31_spill] sm:$0xff] %v1956_v2  ;;  %2450 = vst [vmem:[#allocation64_spill] sm:$0xff] %v1958_v1  ;;  %v1972_v24 = vmul.f32 %v1108_v10, %v1960_v35  ;;  %v1110_v1 = vld [vmem:[#allocation2 + $0x280] sm:$0xff]  ;;  %v1117_v2 = vld [vmem:[#allocation2 + $0x2b8] sm:$0xff] }
 0x1b8   :  { %2451 = vst [vmem:[#allocation65_spill] sm:$0xff] %v1960_v35  ;;  %2452 = vst [vmem:[#allocation66_spill] sm:$0xff] %v1963_v31  ;;  %v1978_v26 = vmul.f32 %v1110_v1, %v1960_v35  ;;  %v1111_v31 = vld [vmem:[#allocation2 + $0x288] sm:$0xff] }
 0x1b9   :  { %2453 = vst [vmem:[#allocation67_spill] sm:$0xff] %v1966_v30  ;;  %2454 = vst [vmem:[#allocation68_spill] sm:$0xff] %v1969_v12  ;;  %v1981_v48 = vmul.f32 %v1111_v31, %v1960_v35  ;;  %v1112_v30 = vld [vmem:[#allocation2 + $0x290] sm:$0xff]  ;;  %v1113_v12 = vld [vmem:[#allocation2 + $0x298] sm:$0xff] }
 0x1ba   :  { %2455 = vst [vmem:[#allocation69_spill] sm:$0xff] %v1972_v24  ;;  %2456 = vst [vmem:[#allocation70_spill] sm:$0xff] %v1975_v4  ;;  %v1984_v21 = vmul.f32 %v1112_v30, %v1960_v35  ;;  %v1987_v10 = vmul.f32 %v1113_v12, %v1960_v35  ;;  %v1114_v24 = vld [vmem:[#allocation2 + $0x2a0] sm:$0xff]  ;;  %v1115_v4 = vld [vmem:[#allocation2 + $0x2a8] sm:$0xff]  ;;  %v1999_v30 = vmul.f32 %v1117_v2, %v1960_v35 }
 0x1bb   :  { %2457 = vst [vmem:[#allocation71_spill] sm:$0xff] %v1978_v26  ;;  %2458 = vst [vmem:[#allocation72_spill] sm:$0xff] %v1981_v48  ;;  %v1990_v29 = vmul.f32 %v1114_v24, %v1960_v35  ;;  %v1993_v1 = vmul.f32 %v1115_v4, %v1960_v35  ;;  %v1116_v26 = vld [vmem:[#allocation2 + $0x2b0] sm:$0xff]  ;;  %v633_v48 = vpop.permute.xlu1 %632  ;;  %v2003_v12 = vmul.f32 %v1960_v35, %v2366_v61  ;;  %v1121_v2 = vld [vmem:[#allocation2 + $0x338] sm:$0xff] }
 0x1bc   :  { %2459 = vst [vmem:[#allocation73_spill] sm:$0xff] %v1984_v21  ;;  %2460 = vst [vmem:[#allocation74_spill] sm:$0xff] %v1987_v10  ;;  %v1996_v31 = vmul.f32 %v1116_v26, %v1960_v35  ;;  %v2007_v24 = vmul.f32 %v1960_v35, %v2367_v55  ;;  %v2011_v4 = vmul.f32 %v1960_v35, %v2368_v59  ;;  %v1120_v10 = vld [vmem:[#allocation2 + $0x330] sm:$0xff]  ;;  %v783_v35 = vpop.permute.xlu0 %782 }
 0x1bd   :  { %2461 = vst [vmem:[#allocation75_spill] sm:$0xff] %v1990_v29  ;;  %2462 = vst [vmem:[#allocation76_spill] sm:$0xff] %v1993_v1  ;;  %v1118_v1 = vld [vmem:[#allocation2 + $0x320] sm:$0xff]  ;;  %v737_v21 = vmul.f32 %v1120_v10, %v633_v48  ;;  %v739_v54 = vmul.f32 %v1122_v27, %v633_v48  ;;  %v740_v61 = vmul.f32 %v633_v48, %v1375_v13 }
 0x1be   :  { %2463 = vst [vmem:[#allocation77_spill] sm:$0xff] %v1996_v31  ;;  %2464 = vst [vmem:[#allocation78_spill] sm:$0xff] %v1999_v30  ;;  %v735_v26 = vmul.f32 %v1118_v1, %v633_v48  ;;  %v1119_v31 = vld [vmem:[#allocation2 + $0x328] sm:$0xff]  ;;  %v738_v30 = vmul.f32 %v1121_v2, %v633_v48  ;;  %v742_v55 = vmul.f32 %v633_v48, %v1409_v41 }
 0x1bf   :  { %2465 = vst [vmem:[#allocation79_spill] sm:$0xff] %v2003_v12  ;;  %2466 = vst [vmem:[#allocation80_spill] sm:$0xff] %v2007_v24  ;;  %v736_v29 = vmul.f32 %v1119_v31, %v633_v48  ;;  %v741_v12 = vmul.f32 %v633_v48, %v1393_v20  ;;  %v743_v24 = vmul.f32 %v633_v48, %v1425_v49 }
 0x1c0   :  { %2467 = vst [vmem:[#allocation81_spill] sm:$0xff] %v2011_v4  ;;  %v744_v59 = vmul.f32 %v633_v48, %v2357_v58  ;;  %v745_v1 = vmul.f32 %v633_v48, %v1459_v53  ;;  %v746_v31 = vmul.f32 %v633_v48, %v1476_v42  ;;  %v747_v10 = vmul.f32 %v633_v48, %v1490_v56  ;;  %v2468_v4 = vld [vmem:[#allocation48_spill] sm:$0xff] }
 0x1c1   :  { %v748_v2 = vmul.f32 %v633_v48, %v1505_v43  ;;  %v749_v27 = vmul.f32 %v633_v48, %v1522_v5  ;;  %v750_v13 = vmul.f32 %v633_v48, %v1535_v9  ;;  %v751_v20 = vmul.f32 %v633_v48, %v1548_v33  ;;  %v2469_v43 = vld [vmem:[#allocation50_spill] sm:$0xff]  ;;  %v2470_v5 = vld [vmem:[#allocation49_spill] sm:$0xff] }
 0x1c2   :  { %v752_v41 = vmul.f32 %v633_v48, %v2468_v4  ;;  %v753_v49 = vmul.f32 %v633_v48, %v1567_v32  ;;  %v754_v58 = vmul.f32 %v633_v48, %v1576_v0  ;;  %v755_v53 = vmul.f32 %v633_v48, %v1588_v44 }
 0x1c3   :  { %v756_v42 = vmul.f32 %v633_v48, %v1595_v60  ;;  %v757_v56 = vmul.f32 %v633_v48, %v1602_v52  ;;  %v758_v25 = vmul.f32 %v633_v48, %v2469_v43  ;;  %v759_v19 = vmul.f32 %v633_v48, %v2470_v5  ;;  %v2033_v48 = vpop.permute.xlu1 %762 }
 0x1c4   :  { %v885_v9 = vadd.f32 %v783_v35, %v735_v26  ;;  %v886_v14 = vadd.f32 %v783_v35, %v736_v29  ;;  %v887_v33 = vadd.f32 %v783_v35, %v737_v21  ;;  %v888_v7 = vadd.f32 %v783_v35, %v738_v30 }
 0x1c5   :  { %v889_v4 = vadd.f32 %v783_v35, %v739_v54  ;;  %v890_v63 = vadd.f32 %v783_v35, %v740_v61  ;;  %v891_v32 = vadd.f32 %v783_v35, %v741_v12  ;;  %v892_v37 = vadd.f32 %v783_v35, %v742_v55  ;;  %v2471_v61 = vld [vmem:[#allocation39_spill] sm:$0xff]  ;;  %v2473_v55 = vld [vmem:[#allocation9_spill] sm:$0xff] }
 0x1c6   :  { %v893_v0 = vadd.f32 %v783_v35, %v743_v24  ;;  %v894_v16 = vadd.f32 %v783_v35, %v744_v59  ;;  %v895_v11 = vadd.f32 %v783_v35, %v745_v1  ;;  %1010 = vst [vmem:[#allocation5 + $0x320] sm:$0xff] %v885_v9  ;;  %1011 = vst [vmem:[#allocation5 + $0x328] sm:$0xff] %v886_v14  ;;  %v2474_v1 = vld [vmem:[#allocation11_spill] sm:$0xff]  ;;  %v2482_v9 = vld [vmem:[#allocation33_spill] sm:$0xff] }
 0x1c7   :  { %1012 = vst [vmem:[#allocation5 + $0x330] sm:$0xff] %v887_v33  ;;  %v896_v60 = vadd.f32 %v783_v35, %v746_v31  ;;  %v897_v44 = vadd.f32 %v783_v35, %v747_v10  ;;  %v898_v52 = vadd.f32 %v783_v35, %v748_v2  ;;  %v899_v43 = vadd.f32 %v783_v35, %v749_v27  ;;  %v2475_v31 = vld [vmem:[#allocation13_spill] sm:$0xff]  ;;  %v2476_v10 = vld [vmem:[#allocation16_spill] sm:$0xff]  ;;  %v2477_v27 = vld [vmem:[#allocation18_spill] sm:$0xff] }
 0x1c8   :  { %1013 = vst [vmem:[#allocation5 + $0x338] sm:$0xff] %v888_v7  ;;  %1014 = vst [vmem:[#allocation5 + $0x340] sm:$0xff] %v889_v4  ;;  %v900_v54 = vadd.f32 %v783_v35, %v750_v13  ;;  %v901_v21 = vadd.f32 %v783_v35, %v751_v20  ;;  %v902_v29 = vadd.f32 %v783_v35, %v752_v41  ;;  %v2478_v20 = vld [vmem:[#allocation20_spill] sm:$0xff]  ;;  %v2483_v4 = vld [vmem:[#allocation35_spill] sm:$0xff] }
 0x1c9   :  { %1015 = vst [vmem:[#allocation5 + $0x348] sm:$0xff] %v890_v63  ;;  %1016 = vst [vmem:[#allocation5 + $0x350] sm:$0xff] %v891_v32  ;;  %v903_v30 = vadd.f32 %v783_v35, %v753_v49  ;;  %v904_v14 = vadd.f32 %v783_v35, %v754_v58  ;;  %v905_v12 = vadd.f32 %v783_v35, %v755_v53  ;;  %v2479_v49 = vld [vmem:[#allocation24_spill] sm:$0xff]  ;;  %v2480_v53 = vld [vmem:[#allocation27_spill] sm:$0xff] }
 0x1ca   :  { %1017 = vst [vmem:[#allocation5 + $0x358] sm:$0xff] %v892_v37  ;;  %1018 = vst [vmem:[#allocation5 + $0x360] sm:$0xff] %v893_v0  ;;  %v906_v24 = vadd.f32 %v783_v35, %v756_v42  ;;  %v907_v26 = vadd.f32 %v783_v35, %v757_v56  ;;  %v908_v63 = vadd.f32 %v783_v35, %v758_v25  ;;  %v2481_v56 = vld [vmem:[#allocation30_spill] sm:$0xff]  ;;  %v2484_v0 = vld [vmem:[#allocation37_spill] sm:$0xff] }
 0x1cb   :  { %1019 = vst [vmem:[#allocation5 + $0x368] sm:$0xff] %v894_v16  ;;  %1020 = vst [vmem:[#allocation5 + $0x370] sm:$0xff] %v895_v11  ;;  %v909_v7 = vadd.f32 %v783_v35, %v759_v19  ;;  %v785_v37 = vadd.f32 %v2033_v48, %v1771_v38  ;;  %v786_v11 = vadd.f32 %v2033_v48, %v1773_v23 }
 0x1cc   :  { %1021 = vst [vmem:[#allocation5 + $0x378] sm:$0xff] %v896_v60  ;;  %1022 = vst [vmem:[#allocation5 + $0x380] sm:$0xff] %v897_v44  ;;  %v787_v16 = vadd.f32 %v2033_v48, %v1775_v40  ;;  %v788_v19 = vadd.f32 %v2033_v48, %v1777_v62  ;;  %v789_v25 = vadd.f32 %v2033_v48, %v1779_v8  ;;  %v2472_v8 = vld [vmem:[#allocation8_spill] sm:$0xff] }
 0x1cd   :  { %1023 = vst [vmem:[#allocation5 + $0x388] sm:$0xff] %v898_v52  ;;  %1024 = vst [vmem:[#allocation5 + $0x390] sm:$0xff] %v899_v43  ;;  %v790_v35 = vadd.f32 %v2033_v48, %v1781_v18  ;;  %v791_v38 = vadd.f32 %v2033_v48, %v1783_v17  ;;  %v792_v23 = vadd.f32 %v2033_v48, %v1785_v47 }
 0x1ce   :  { %1025 = vst [vmem:[#allocation5 + $0x398] sm:$0xff] %v900_v54  ;;  %1026 = vst [vmem:[#allocation5 + $0x3a0] sm:$0xff] %v901_v21  ;;  %v793_v40 = vadd.f32 %v2033_v48, %v1787_v36  ;;  %v794_v62 = vadd.f32 %v2033_v48, %v2471_v61  ;;  %v795_v18 = vadd.f32 %v2033_v48, %v2472_v8  ;;  %v2064_v36 = vpop.permute.xlu1 %767  ;;  %v2496_v61 = vld [vmem:[#allocation23_spill] sm:$0xff]  ;;  %v2497_v8 = vld [vmem:[#allocation26_spill] sm:$0xff] }
 0x1cf   :  { %1027 = vst [vmem:[#allocation5 + $0x3a8] sm:$0xff] %v902_v29  ;;  %1028 = vst [vmem:[#allocation5 + $0x3b0] sm:$0xff] %v903_v30  ;;  %v796_v59 = vadd.f32 %v2033_v48, %v2473_v55  ;;  %v797_v17 = vadd.f32 %v2033_v48, %v2474_v1  ;;  %v798_v47 = vadd.f32 %v2033_v48, %v2475_v31  ;;  %v2486_v30 = vld [vmem:[#allocation43_spill] sm:$0xff]  ;;  %v2498_v55 = vld [vmem:[#allocation29_spill] sm:$0xff] }
 0x1d0   :  { %1029 = vst [vmem:[#allocation5 + $0x3b8] sm:$0xff] %v904_v14  ;;  %1030 = vst [vmem:[#allocation5 + $0x3c0] sm:$0xff] %v905_v12  ;;  %v799_v2 = vadd.f32 %v2033_v48, %v2476_v10  ;;  %v800_v13 = vadd.f32 %v2033_v48, %v2477_v27  ;;  %v801_v41 = vadd.f32 %v2033_v48, %v2478_v20  ;;  %v2499_v1 = vld [vmem:[#allocation32_spill] sm:$0xff]  ;;  %v2500_v31 = vld [vmem:[#allocation34_spill] sm:$0xff] }
 0x1d1   :  { %1031 = vst [vmem:[#allocation5 + $0x3c8] sm:$0xff] %v906_v24  ;;  %1032 = vst [vmem:[#allocation5 + $0x3d0] sm:$0xff] %v907_v26  ;;  %v802_v58 = vadd.f32 %v2033_v48, %v2479_v49  ;;  %v803_v42 = vadd.f32 %v2033_v48, %v2480_v53  ;;  %v804_v5 = vadd.f32 %v2033_v48, %v2481_v56  ;;  %v2489_v24 = vld [vmem:[#allocation46_spill] sm:$0xff]  ;;  %v2501_v10 = vld [vmem:[#allocation36_spill] sm:$0xff] }
 0x1d2   :  { %1033 = vst [vmem:[#allocation5 + $0x3d8] sm:$0xff] %v908_v63  ;;  %1034 = vst.msk [vmem:[#allocation5 + $0x3e0] sm:$0xff] %vm177_vm0, %v909_v7  ;;  %v805_v33 = vadd.f32 %v2033_v48, %v2482_v9  ;;  %v806_v32 = vadd.f32 %v2033_v48, %v2483_v4  ;;  %v807_v60 = vadd.f32 %v2033_v48, %v2484_v0  ;;  %v2502_v27 = vld [vmem:[#allocation38_spill] sm:$0xff] }
 0x1d3   :  { %910 = vst [vmem:[#allocation5] sm:$0xff] %v785_v37  ;;  %911 = vst [vmem:[#allocation5 + $0x8] sm:$0xff] %v786_v11  ;;  %v808_v44 = vadd.f32 %v2033_v48, %v1830_v39  ;;  %v809_v52 = vadd.f32 %v2033_v48, %v1833_v46  ;;  %v810_v43 = vadd.f32 %v2064_v36, %v1835_v34  ;;  %v2123_v37 = vpop.permute.xlu1 %772  ;;  %v2492_v11 = vld [vmem:[#allocation12_spill] sm:$0xff]  ;;  %v2503_v20 = vld [vmem:[#allocation42_spill] sm:$0xff] }
 0x1d4   :  { %912 = vst [vmem:[#allocation5 + $0x10] sm:$0xff] %v787_v16  ;;  %913 = vst [vmem:[#allocation5 + $0x18] sm:$0xff] %v788_v19  ;;  %v811_v54 = vadd.f32 %v2064_v36, %v1837_v57  ;;  %v812_v39 = vadd.f32 %v2064_v36, %v1839_v22  ;;  %v813_v46 = vadd.f32 %v2064_v36, %v1841_v15  ;;  %v2485_v57 = vld [vmem:[#allocation41_spill] sm:$0xff]  ;;  %v2493_v19 = vld [vmem:[#allocation15_spill] sm:$0xff] }
 0x1d5   :  { %914 = vst [vmem:[#allocation5 + $0x20] sm:$0xff] %v789_v25  ;;  %915 = vst [vmem:[#allocation5 + $0x28] sm:$0xff] %v790_v35  ;;  %v814_v48 = vadd.f32 %v2064_v36, %v1844_v6  ;;  %v815_v34 = vadd.f32 %v2064_v36, %v1847_v45  ;;  %v816_v21 = vadd.f32 %v2064_v36, %v1850_v51  ;;  %v2487_v45 = vld [vmem:[#allocation44_spill] sm:$0xff]  ;;  %v2488_v51 = vld [vmem:[#allocation45_spill] sm:$0xff] }
 0x1d6   :  { %916 = vst [vmem:[#allocation5 + $0x30] sm:$0xff] %v791_v38  ;;  %917 = vst [vmem:[#allocation5 + $0x38] sm:$0xff] %v792_v23  ;;  %v817_v29 = vadd.f32 %v2064_v36, %v2485_v57  ;;  %v818_v22 = vadd.f32 %v2064_v36, %v1856_v3  ;;  %v819_v15 = vadd.f32 %v2064_v36, %v1859_v28  ;;  %v2490_v28 = vld [vmem:[#allocation47_spill] sm:$0xff]  ;;  %v2494_v35 = vld [vmem:[#allocation17_spill] sm:$0xff] }
 0x1d7   :  { %918 = vst [vmem:[#allocation5 + $0x40] sm:$0xff] %v793_v40  ;;  %919 = vst [vmem:[#allocation5 + $0x48] sm:$0xff] %v794_v62  ;;  %v820_v6 = vadd.f32 %v2064_v36, %v1862_v50  ;;  %v821_v14 = vadd.f32 %v2064_v36, %v2486_v30  ;;  %v822_v12 = vadd.f32 %v2064_v36, %v2487_v45  ;;  %v2491_v50 = vld [vmem:[#allocation10_spill] sm:$0xff]  ;;  %v2495_v23 = vld [vmem:[#allocation19_spill] sm:$0xff] }
 0x1d8   :  { %920 = vst [vmem:[#allocation5 + $0x50] sm:$0xff] %v795_v18  ;;  %921 = vst [vmem:[#allocation5 + $0x58] sm:$0xff] %v796_v59  ;;  %v823_v3 = vadd.f32 %v2064_v36, %v2488_v51  ;;  %v824_v26 = vadd.f32 %v2064_v36, %v2489_v24  ;;  %v825_v63 = vadd.f32 %v2064_v36, %v2490_v28  ;;  %v2515_v57 = vld [vmem:[#allocation59_spill] sm:$0xff] }
 0x1d9   :  { %922 = vst [vmem:[#allocation5 + $0x60] sm:$0xff] %v797_v17  ;;  %923 = vst [vmem:[#allocation5 + $0x68] sm:$0xff] %v798_v47  ;;  %v826_v7 = vadd.f32 %v2064_v36, %v2491_v50  ;;  %v827_v16 = vadd.f32 %v2064_v36, %v2492_v11  ;;  %v828_v25 = vadd.f32 %v2064_v36, %v2493_v19  ;;  %v2524_v19 = vld [vmem:[#allocation64_spill] sm:$0xff] }
 0x1da   :  { %924 = vst [vmem:[#allocation5 + $0x70] sm:$0xff] %v799_v2  ;;  %925 = vst [vmem:[#allocation5 + $0x78] sm:$0xff] %v800_v13  ;;  %v829_v38 = vadd.f32 %v2064_v36, %v2494_v35  ;;  %v830_v40 = vadd.f32 %v2064_v36, %v2495_v23  ;;  %v831_v62 = vadd.f32 %v2064_v36, %v2496_v61  ;;  %v1123_v35 = vld [vmem:[#allocation2 + $0x2d8] sm:$0xff] }
 0x1db   :  { %926 = vst [vmem:[#allocation5 + $0x80] sm:$0xff] %v801_v41  ;;  %927 = vst [vmem:[#allocation5 + $0x88] sm:$0xff] %v802_v58  ;;  %v832_v18 = vadd.f32 %v2064_v36, %v2497_v8  ;;  %v833_v59 = vadd.f32 %v2064_v36, %v2498_v55  ;;  %v834_v17 = vadd.f32 %v2064_v36, %v2499_v1  ;;  %v2504_v41 = vld [vmem:[#allocation40_spill] sm:$0xff]  ;;  %v2505_v58 = vld [vmem:[#allocation14_spill] sm:$0xff] }
 0x1dc   :  { %928 = vst [vmem:[#allocation5 + $0x90] sm:$0xff] %v803_v42  ;;  %929 = vst [vmem:[#allocation5 + $0x98] sm:$0xff] %v804_v5  ;;  %v835_v47 = vadd.f32 %v2123_v37, %v2500_v31  ;;  %v836_v2 = vadd.f32 %v2123_v37, %v2501_v10  ;;  %v837_v13 = vadd.f32 %v2123_v37, %v2502_v27  ;;  %v2506_v42 = vld [vmem:[#allocation21_spill] sm:$0xff]  ;;  %v2507_v5 = vld [vmem:[#allocation51_spill] sm:$0xff] }
 0x1dd   :  { %930 = vst [vmem:[#allocation5 + $0xa0] sm:$0xff] %v805_v33  ;;  %931 = vst [vmem:[#allocation5 + $0xa8] sm:$0xff] %v806_v32  ;;  %v838_v36 = vadd.f32 %v2123_v37, %v2503_v20  ;;  %v839_v49 = vadd.f32 %v2123_v37, %v2504_v41  ;;  %v840_v53 = vadd.f32 %v2123_v37, %v2505_v58  ;;  %v2508_v33 = vld [vmem:[#allocation52_spill] sm:$0xff]  ;;  %v2509_v32 = vld [vmem:[#allocation53_spill] sm:$0xff] }
 0x1de   :  { %932 = vst [vmem:[#allocation5 + $0xb0] sm:$0xff] %v807_v60  ;;  %933 = vst [vmem:[#allocation5 + $0xb8] sm:$0xff] %v808_v44  ;;  %v841_v56 = vadd.f32 %v2123_v37, %v2506_v42  ;;  %v842_v9 = vadd.f32 %v2123_v37, %v2507_v5  ;;  %v843_v4 = vadd.f32 %v2123_v37, %v2508_v33  ;;  %v2510_v60 = vld [vmem:[#allocation54_spill] sm:$0xff]  ;;  %v1127_v55 = vld [vmem:[#allocation2 + $0x2f8] sm:$0xff] }
 0x1df   :  { %934 = vst.msk [vmem:[#allocation5 + $0xc0] sm:$0xff] %vm177_vm0, %v809_v52  ;;  %935 = vst [vmem:[#allocation5 + $0xc8] sm:$0xff] %v810_v43  ;;  %v844_v0 = vadd.f32 %v2123_v37, %v2509_v32  ;;  %v845_v44 = vadd.f32 %v2123_v37, %v2510_v60  ;;  %v2511_v52 = vld [vmem:[#allocation55_spill] sm:$0xff]  ;;  %v1128_v1 = vld [vmem:[#allocation2 + $0x300] sm:$0xff] }
 0x1e0   :  { %936 = vst [vmem:[#allocation5 + $0xd0] sm:$0xff] %v811_v54  ;;  %937 = vst [vmem:[#allocation5 + $0xd8] sm:$0xff] %v812_v39  ;;  %v846_v43 = vadd.f32 %v2123_v37, %v2511_v52  ;;  %v2512_v54 = vld [vmem:[#allocation56_spill] sm:$0xff]  ;;  %v1129_v31 = vld [vmem:[#allocation2 + $0x308] sm:$0xff] }
 0x1e1   :  { %938 = vst [vmem:[#allocation5 + $0xe0] sm:$0xff] %v813_v46  ;;  %939 = vst [vmem:[#allocation5 + $0xe8] sm:$0xff] %v814_v48  ;;  %v847_v39 = vadd.f32 %v2123_v37, %v2512_v54  ;;  %v2513_v46 = vld [vmem:[#allocation57_spill] sm:$0xff]  ;;  %v1130_v10 = vld [vmem:[#allocation2 + $0x310] sm:$0xff] }
 0x1e2   :  { %940 = vst [vmem:[#allocation5 + $0xf0] sm:$0xff] %v815_v34  ;;  %941 = vst [vmem:[#allocation5 + $0xf8] sm:$0xff] %v816_v21  ;;  %v848_v48 = vadd.f32 %v2123_v37, %v2513_v46  ;;  %v2514_v34 = vld [vmem:[#allocation58_spill] sm:$0xff]  ;;  %v1131_v27 = vld [vmem:[#allocation2 + $0x318] sm:$0xff] }
 0x1e3   :  { %942 = vst [vmem:[#allocation5 + $0x100] sm:$0xff] %v817_v29  ;;  %943 = vst [vmem:[#allocation5 + $0x108] sm:$0xff] %v818_v22  ;;  %v849_v21 = vadd.f32 %v2123_v37, %v2514_v34  ;;  %v850_v29 = vadd.f32 %v2123_v37, %v2515_v57  ;;  %v2516_v22 = vld [vmem:[#allocation60_spill] sm:$0xff]  ;;  %v2526_v20 = vld [vmem:[#allocation66_spill] sm:$0xff] }
 0x1e4   :  { %944 = vst [vmem:[#allocation5 + $0x110] sm:$0xff] %v819_v15  ;;  %945 = vst [vmem:[#allocation5 + $0x118] sm:$0xff] %v820_v6  ;;  %v851_v15 = vadd.f32 %v2123_v37, %v2516_v22  ;;  %v2517_v6 = vld [vmem:[#allocation61_spill] sm:$0xff]  ;;  %v2527_v41 = vld [vmem:[#allocation67_spill] sm:$0xff] }
 0x1e5   :  { %946 = vst [vmem:[#allocation5 + $0x120] sm:$0xff] %v821_v14  ;;  %947 = vst [vmem:[#allocation5 + $0x128] sm:$0xff] %v822_v12  ;;  %v852_v30 = vadd.f32 %v2123_v37, %v2517_v6  ;;  %v2518_v14 = vld [vmem:[#allocation62_spill] sm:$0xff]  ;;  %v2519_v12 = vld [vmem:[#allocation63_spill] sm:$0xff] }
 0x1e6   :  { %948 = vst [vmem:[#allocation5 + $0x130] sm:$0xff] %v823_v3  ;;  %949 = vst [vmem:[#allocation5 + $0x138] sm:$0xff] %v824_v26  ;;  %v853_v45 = vadd.f32 %v2123_v37, %v2518_v14  ;;  %v854_v51 = vadd.f32 %v2123_v37, %v2519_v12  ;;  %v2520_v3 = vld [vmem:[#allocation22_spill] sm:$0xff]  ;;  %v2521_v26 = vld [vmem:[#allocation25_spill] sm:$0xff] }
 0x1e7   :  { %950 = vst [vmem:[#allocation5 + $0x140] sm:$0xff] %v825_v63  ;;  %951 = vst [vmem:[#allocation5 + $0x148] sm:$0xff] %v826_v7  ;;  %v855_v24 = vadd.f32 %v2123_v37, %v2520_v3  ;;  %v856_v28 = vadd.f32 %v2123_v37, %v2521_v26  ;;  %v2522_v63 = vld [vmem:[#allocation28_spill] sm:$0xff]  ;;  %v2523_v7 = vld [vmem:[#allocation31_spill] sm:$0xff] }
 0x1e8   :  { %952 = vst [vmem:[#allocation5 + $0x150] sm:$0xff] %v827_v16  ;;  %953 = vst [vmem:[#allocation5 + $0x158] sm:$0xff] %v828_v25  ;;  %v857_v50 = vadd.f32 %v2123_v37, %v2522_v63  ;;  %v858_v11 = vadd.f32 %v2123_v37, %v2523_v7  ;;  %v2190_v16 = vpop.permute.xlu1 %777  ;;  %v859_v25 = vadd.f32 %v2123_v37, %v2524_v19  ;;  %v2528_v58 = vld [vmem:[#allocation68_spill] sm:$0xff]  ;;  %v2529_v42 = vld [vmem:[#allocation69_spill] sm:$0xff] }
 0x1e9   :  { %954 = vst [vmem:[#allocation5 + $0x160] sm:$0xff] %v829_v38  ;;  %955 = vst [vmem:[#allocation5 + $0x168] sm:$0xff] %v830_v40  ;;  %v2525_v38 = vld [vmem:[#allocation65_spill] sm:$0xff]  ;;  %v1124_v40 = vld [vmem:[#allocation2 + $0x2e0] sm:$0xff] }
 0x1ea   :  { %956 = vst [vmem:[#allocation5 + $0x170] sm:$0xff] %v831_v62  ;;  %957 = vst [vmem:[#allocation5 + $0x178] sm:$0xff] %v832_v18  ;;  %v726_v23 = vmul.f32 %v1123_v35, %v2525_v38  ;;  %v727_v61 = vmul.f32 %v1124_v40, %v2525_v38  ;;  %v1125_v62 = vld [vmem:[#allocation2 + $0x2e8] sm:$0xff]  ;;  %v1126_v18 = vld [vmem:[#allocation2 + $0x2f0] sm:$0xff] }
 0x1eb   :  { %958 = vst [vmem:[#allocation5 + $0x180] sm:$0xff] %v833_v59  ;;  %959 = vst.msk [vmem:[#allocation5 + $0x188] sm:$0xff] %vm177_vm0, %v834_v17  ;;  %v728_v8 = vmul.f32 %v1125_v62, %v2525_v38  ;;  %v729_v37 = vmul.f32 %v1126_v18, %v2525_v38  ;;  %v730_v59 = vmul.f32 %v1127_v55, %v2525_v38  ;;  %v2530_v5 = vld [vmem:[#allocation70_spill] sm:$0xff]  ;;  %v2531_v33 = vld [vmem:[#allocation71_spill] sm:$0xff] }
 0x1ec   :  { %960 = vst [vmem:[#allocation5 + $0x190] sm:$0xff] %v835_v47  ;;  %961 = vst [vmem:[#allocation5 + $0x198] sm:$0xff] %v836_v2  ;;  %v731_v17 = vmul.f32 %v1128_v1, %v2525_v38  ;;  %v732_v47 = vmul.f32 %v1129_v31, %v2525_v38  ;;  %v733_v2 = vmul.f32 %v1130_v10, %v2525_v38  ;;  %v2532_v32 = vld [vmem:[#allocation72_spill] sm:$0xff]  ;;  %v2533_v60 = vld [vmem:[#allocation73_spill] sm:$0xff] }
 0x1ed   :  { %962 = vst [vmem:[#allocation5 + $0x1a0] sm:$0xff] %v837_v13  ;;  %963 = vst [vmem:[#allocation5 + $0x1a8] sm:$0xff] %v838_v36  ;;  %v734_v13 = vmul.f32 %v1131_v27, %v2525_v38  ;;  %v860_v36 = vadd.f32 %v2190_v16, %v2526_v20  ;;  %v2534_v52 = vld [vmem:[#allocation74_spill] sm:$0xff]  ;;  %v2535_v54 = vld [vmem:[#allocation75_spill] sm:$0xff]  ;;  %v876_v12 = vadd.f32 %v2190_v16, %v726_v23 }
 0x1ee   :  { %964 = vst [vmem:[#allocation5 + $0x1b0] sm:$0xff] %v839_v49  ;;  %965 = vst [vmem:[#allocation5 + $0x1b8] sm:$0xff] %v840_v53  ;;  %v861_v49 = vadd.f32 %v2190_v16, %v2527_v41  ;;  %v862_v53 = vadd.f32 %v2190_v16, %v2528_v58  ;;  %v2536_v46 = vld [vmem:[#allocation76_spill] sm:$0xff]  ;;  %v2537_v34 = vld [vmem:[#allocation77_spill] sm:$0xff]  ;;  %v878_v3 = vadd.f32 %v2190_v16, %v728_v8 }
 0x1ef   :  { %966 = vst [vmem:[#allocation5 + $0x1c0] sm:$0xff] %v841_v56  ;;  %967 = vst [vmem:[#allocation5 + $0x1c8] sm:$0xff] %v842_v9  ;;  %v863_v56 = vadd.f32 %v2190_v16, %v2529_v42  ;;  %v864_v9 = vadd.f32 %v2190_v16, %v2530_v5  ;;  %v2538_v57 = vld [vmem:[#allocation78_spill] sm:$0xff]  ;;  %v2539_v22 = vld [vmem:[#allocation79_spill] sm:$0xff]  ;;  %v880_v26 = vadd.f32 %v2190_v16, %v730_v59 }
 0x1f0   :  { %968 = vst [vmem:[#allocation5 + $0x1d0] sm:$0xff] %v843_v4  ;;  %969 = vst [vmem:[#allocation5 + $0x1d8] sm:$0xff] %v844_v0  ;;  %v865_v4 = vadd.f32 %v2190_v16, %v2531_v33  ;;  %v866_v0 = vadd.f32 %v2190_v16, %v2532_v32  ;;  %v2540_v6 = vld [vmem:[#allocation80_spill] sm:$0xff]  ;;  %v2541_v14 = vld [vmem:[#allocation81_spill] sm:$0xff]  ;;  %v882_v63 = vadd.f32 %v2190_v16, %v732_v47 }
 0x1f1   :  { %970 = vst [vmem:[#allocation5 + $0x1e0] sm:$0xff] %v845_v44  ;;  %971 = vst [vmem:[#allocation5 + $0x1e8] sm:$0xff] %v846_v43  ;;  %v867_v44 = vadd.f32 %v2190_v16, %v2533_v60  ;;  %v868_v43 = vadd.f32 %v2190_v16, %v2534_v52  ;;  %v884_v7 = vadd.f32 %v2190_v16, %v734_v13 }
 0x1f2   :  { %972 = vst [vmem:[#allocation5 + $0x1f0] sm:$0xff] %v847_v39  ;;  %973 = vst [vmem:[#allocation5 + $0x1f8] sm:$0xff] %v848_v48  ;;  %v869_v39 = vadd.f32 %v2190_v16, %v2535_v54  ;;  %v870_v48 = vadd.f32 %v2190_v16, %v2536_v46 }
 0x1f3   :  { %974 = vst [vmem:[#allocation5 + $0x200] sm:$0xff] %v849_v21  ;;  %975 = vst [vmem:[#allocation5 + $0x208] sm:$0xff] %v850_v29  ;;  %v871_v21 = vadd.f32 %v2190_v16, %v2537_v34  ;;  %v872_v29 = vadd.f32 %v2190_v16, %v2538_v57 }
 0x1f4   :  { %976 = vst [vmem:[#allocation5 + $0x210] sm:$0xff] %v851_v15  ;;  %977 = vst [vmem:[#allocation5 + $0x218] sm:$0xff] %v852_v30  ;;  %v873_v15 = vadd.f32 %v2190_v16, %v2539_v22  ;;  %v874_v30 = vadd.f32 %v2190_v16, %v2540_v6 }
 0x1f5   :  { %978 = vst [vmem:[#allocation5 + $0x220] sm:$0xff] %v853_v45  ;;  %979 = vst [vmem:[#allocation5 + $0x228] sm:$0xff] %v854_v51  ;;  %v875_v45 = vadd.f32 %v2190_v16, %v2541_v14  ;;  %v877_v51 = vadd.f32 %v2190_v16, %v727_v61 }
 0x1f6   :  { %980 = vst [vmem:[#allocation5 + $0x230] sm:$0xff] %v855_v24  ;;  %981 = vst [vmem:[#allocation5 + $0x238] sm:$0xff] %v856_v28  ;;  %v879_v24 = vadd.f32 %v2190_v16, %v729_v37  ;;  %v881_v28 = vadd.f32 %v2190_v16, %v731_v17 }
 0x1f7   :  { %982 = vst [vmem:[#allocation5 + $0x240] sm:$0xff] %v857_v50  ;;  %983 = vst [vmem:[#allocation5 + $0x248] sm:$0xff] %v858_v11  ;;  %v883_v50 = vadd.f32 %v2190_v16, %v733_v2 }
 0x1f8   :  { %984 = vst.msk [vmem:[#allocation5 + $0x250] sm:$0xff] %vm177_vm0, %v859_v25  ;;  %985 = vst [vmem:[#allocation5 + $0x258] sm:$0xff] %v860_v36 }
 0x1f9   :  { %986 = vst [vmem:[#allocation5 + $0x260] sm:$0xff] %v861_v49  ;;  %987 = vst [vmem:[#allocation5 + $0x268] sm:$0xff] %v862_v53 }
 0x1fa   :  { %988 = vst [vmem:[#allocation5 + $0x270] sm:$0xff] %v863_v56  ;;  %989 = vst [vmem:[#allocation5 + $0x278] sm:$0xff] %v864_v9 }
 0x1fb   :  { %990 = vst [vmem:[#allocation5 + $0x280] sm:$0xff] %v865_v4  ;;  %991 = vst [vmem:[#allocation5 + $0x288] sm:$0xff] %v866_v0 }
 0x1fc   :  { %992 = vst [vmem:[#allocation5 + $0x290] sm:$0xff] %v867_v44  ;;  %993 = vst [vmem:[#allocation5 + $0x298] sm:$0xff] %v868_v43 }
 0x1fd   :  { %994 = vst [vmem:[#allocation5 + $0x2a0] sm:$0xff] %v869_v39  ;;  %995 = vst [vmem:[#allocation5 + $0x2a8] sm:$0xff] %v870_v48 }
 0x1fe   :  { %996 = vst [vmem:[#allocation5 + $0x2b0] sm:$0xff] %v871_v21  ;;  %997 = vst [vmem:[#allocation5 + $0x2b8] sm:$0xff] %v872_v29 }
 0x1ff   :  { %998 = vst [vmem:[#allocation5 + $0x2c0] sm:$0xff] %v873_v15  ;;  %999 = vst [vmem:[#allocation5 + $0x2c8] sm:$0xff] %v874_v30 }
 0x200   :  { %1000 = vst [vmem:[#allocation5 + $0x2d0] sm:$0xff] %v875_v45  ;;  %1001 = vst [vmem:[#allocation5 + $0x2d8] sm:$0xff] %v876_v12 }
 0x201   :  { %1002 = vst [vmem:[#allocation5 + $0x2e0] sm:$0xff] %v877_v51  ;;  %1003 = vst [vmem:[#allocation5 + $0x2e8] sm:$0xff] %v878_v3 }
 0x202   :  { %1004 = vst [vmem:[#allocation5 + $0x2f0] sm:$0xff] %v879_v24  ;;  %1005 = vst [vmem:[#allocation5 + $0x2f8] sm:$0xff] %v880_v26 }
 0x203   :  { %1006 = vst [vmem:[#allocation5 + $0x300] sm:$0xff] %v881_v28  ;;  %1007 = vst [vmem:[#allocation5 + $0x308] sm:$0xff] %v882_v63 }
 0x204   :  { %1008 = vst [vmem:[#allocation5 + $0x310] sm:$0xff] %v883_v50  ;;  %1009 = vst.msk [vmem:[#allocation5 + $0x318] sm:$0xff] %vm177_vm0, %v884_v7 }
 0x205   :  { %1165 = shalt.err (!%p1162_p12)
}
 0x206   :  { %s1166_s21 = scalar_lea.hbm %s2264_s3, 16000 }
 0x207   :  { %p1167_p13 = scmp.ne.s32.totalorder %s2264_s3, %s1166_s21  ;;  %p1170_p0 = scmp.lt.u32.totalorder %s1166_s21, %s2264_s3 }
 0x209   :  { %p1172_p1 = pnand %p1170_p0, %p1167_p13 }
 0x20b   :  { %1175 = shalt.err (!%p1172_p1)
}
 0x20c   :  { %1046 = dma.vmem_to_hbm [thread:$0]  %s1041_s17, 16000, %s2264_s3, [#allocation4], %s1181_s22, %s1181_s22, %s1182_s23  }
 0x20d   :  { %1178 = dma.done.wait [#allocation4], 16000  }
 0x20e   :  { %1179 = vsyncadd [#allocation4], 4294951296 }
 0x20f   :  { %1050 = vsyncpa [#allocation3], 1 }
 0x210   :  { %1051 = vsyncpa [#allocation4], 1 }

</bundles_post_ra>
